<compile_context>
chip_gen: v7x
topology: tpu7x:2x2x1
jax: 0.10.0
libtpu: 0.0.40
codegen_flags: <defaults>
</compile_context>

<pallas_src>
import jax
import jax.numpy as jnp
from jax.experimental import pallas as pl
from jax.experimental.pallas import tpu as pltpu

EPS = 1e-5
IN_F = 1 + 3 * 15   # 46
H1 = 512
H2 = 128
OUT_F = 1


# --------------------------------------------------------------------------- kernels
def _pack_stats(hf):
    """Pack per-tile (sum, sum_of_squares) of hf (TB, C) into an (8, C) f32 slab."""
    c = hf.shape[1]
    s = jnp.sum(hf, axis=0, keepdims=True)           # (1, C)
    ss = jnp.sum(hf * hf, axis=0, keepdims=True)      # (1, C)
    rows = jax.lax.broadcasted_iota(jnp.int32, (8, c), 0)
    return jnp.where(rows == 0, s, 0.0) + jnp.where(rows == 1, ss, 0.0)


def _stage1_kernel(x_ref, w1_ref, b1_ref, h1_ref, st_ref):
    # fc1 in bf16 on the MXU, f32 accumulation; emit bf16 h1 + BN1 partial stats.
    xb = x_ref[...].astype(jnp.bfloat16)
    h = jnp.dot(xb, w1_ref[...], preferred_element_type=jnp.float32) + b1_ref[...]
    hb = h.astype(jnp.bfloat16)
    h1_ref[...] = hb
    st_ref[...] = _pack_stats(hb.astype(jnp.float32))


def _stage2_kernel(h1_ref, sc_ref, sh_ref, w2_ref, b2_ref, h2_ref, st_ref):
    # BN1 (precomputed global scale/shift, f32) + ReLU, then fc2 in bf16.
    a = h1_ref[...].astype(jnp.float32) * sc_ref[...] + sh_ref[...]
    a = jnp.maximum(a, 0.0).astype(jnp.bfloat16)
    h = jnp.dot(a, w2_ref[...], preferred_element_type=jnp.float32) + b2_ref[...]
    hb = h.astype(jnp.bfloat16)
    h2_ref[...] = hb
    st_ref[...] = _pack_stats(hb.astype(jnp.float32))


def _stage3_kernel(h2_ref, sc_ref, sh_ref, w3_ref, b3_ref, o_ref):
    # BN2 + ReLU + fc3 (N=1) as VPU multiply + lane reduction.
    a = h2_ref[...].astype(jnp.float32) * sc_ref[...] + sh_ref[...]
    a = jnp.maximum(a, 0.0)
    # output last dim is 1 -> masked store; output bytes are negligible here.
    o_ref[...] = (jnp.sum(a * w3_ref[...], axis=-1, keepdims=True)
                  + b3_ref[...]).astype(o_ref.dtype)


# --------------------------------------------------------------------------- wrapper
def _pick_tb(batch, target=2048):
    """Largest tile <= target that divides the batch (multiple of 128), else whole batch."""
    if batch <= target:
        return batch
    tb = target
    while tb >= 128:
        if batch % tb == 0:
            return tb
        tb -= 128
    return batch


def _bn_scale_shift(partials, nt, batch, gamma, beta):
    """Combine per-tile partial stats -> global training-mode BN scale/shift (f32)."""
    st = partials.reshape(nt, 8, -1)
    s = jnp.sum(st[:, 0, :], axis=0)                  # (C,)
    ss = jnp.sum(st[:, 1, :], axis=0)                 # (C,)
    mu = s / batch
    var = ss / batch - mu * mu                         # biased variance
    inv = jax.lax.rsqrt(var + EPS)
    scale = gamma * inv[None]                          # gamma is (1, C)
    shift = beta - mu[None] * scale
    return scale.astype(jnp.float32), shift.astype(jnp.float32)


def calibration_head(x, params, tb=None):
    """x: (B, 46) float32 -> (B, 1) float32."""
    B, f = x.shape
    assert f == IN_F
    if tb is None:
        tb = _pick_tb(B)
    assert B % tb == 0 and (tb == B or tb % 16 == 0), "tile must divide B (mult of 16)"
    nt = B // tb

    bf16, f32 = jnp.bfloat16, jnp.float32
    w1 = params["w1"].astype(bf16)
    w2 = params["w2"].astype(bf16)
    w3_row = params["w3"].reshape(1, H2).astype(f32)
    b3 = params["b3"].reshape(1, 1).astype(f32)

    cp = pltpu.CompilerParams(dimension_semantics=("parallel",))

    # ---- stage 1: fc1 + BN1 partial stats ----
    h1, st1 = pl.pallas_call(
        _stage1_kernel,
        grid=(nt,),
        in_specs=[pl.BlockSpec((tb, IN_F), lambda i: (i, 0)),
                  pl.BlockSpec((IN_F, H1), lambda i: (0, 0)),
                  pl.BlockSpec((1, H1), lambda i: (0, 0))],
        out_specs=[pl.BlockSpec((tb, H1), lambda i: (i, 0)),
                   pl.BlockSpec((8, H1), lambda i: (i, 0))],
        out_shape=[jax.ShapeDtypeStruct((B, H1), bf16),
                   jax.ShapeDtypeStruct((nt * 8, H1), f32)],
        compiler_params=cp,
    )(x, w1, params["b1"])
    scale1, shift1 = _bn_scale_shift(st1, nt, B, params["g1"], params["be1"])

    # ---- stage 2: BN1 + ReLU + fc2 + BN2 partial stats ----
    h2, st2 = pl.pallas_call(
        _stage2_kernel,
        grid=(nt,),
        in_specs=[pl.BlockSpec((tb, H1), lambda i: (i, 0)),
                  pl.BlockSpec((1, H1), lambda i: (0, 0)),
                  pl.BlockSpec((1, H1), lambda i: (0, 0)),
                  pl.BlockSpec((H1, H2), lambda i: (0, 0)),
                  pl.BlockSpec((1, H2), lambda i: (0, 0))],
        out_specs=[pl.BlockSpec((tb, H2), lambda i: (i, 0)),
                   pl.BlockSpec((8, H2), lambda i: (i, 0))],
        out_shape=[jax.ShapeDtypeStruct((B, H2), bf16),
                   jax.ShapeDtypeStruct((nt * 8, H2), f32)],
        compiler_params=cp,
    )(h1, scale1, shift1, w2, params["b2"])
    scale2, shift2 = _bn_scale_shift(st2, nt, B, params["g2"], params["be2"])

    # ---- stage 3: BN2 + ReLU + fc3 ----
    out = pl.pallas_call(
        _stage3_kernel,
        grid=(nt,),
        in_specs=[pl.BlockSpec((tb, H2), lambda i: (i, 0)),
                  pl.BlockSpec((1, H2), lambda i: (0, 0)),
                  pl.BlockSpec((1, H2), lambda i: (0, 0)),
                  pl.BlockSpec((1, H2), lambda i: (0, 0)),
                  pl.BlockSpec((1, 1), lambda i: (0, 0))],
        out_specs=pl.BlockSpec((tb, OUT_F), lambda i: (i, 0)),
        out_shape=jax.ShapeDtypeStruct((B, OUT_F), f32),
        compiler_params=cp,
    )(h2, scale2, shift2, w3_row, b3)
    return out


# --------------------------------------------------------------------------- params / refs
def init_params(key):
    """PyTorch-default-style init (Linear: U(+/-1/sqrt(fan_in)); BN: gamma=1, beta=0).
    Linear weights stored pre-transposed as (in, out)."""
    ks = jax.random.split(key, 6)

    def linear(kw, kb, fan_in, fan_out):
        bound = 1.0 / jnp.sqrt(fan_in)
        w = jax.random.uniform(kw, (fan_in, fan_out), jnp.float32, -bound, bound)
        b = jax.random.uniform(kb, (1, fan_out), jnp.float32, -bound, bound)
        return w, b

    w1, b1 = linear(ks[0], ks[1], IN_F, H1)
    w2, b2 = linear(ks[2], ks[3], H1, H2)
    w3, b3 = linear(ks[4], ks[5], H2, OUT_F)
    return dict(
        w1=w1, b1=b1, g1=jnp.ones((1, H1), jnp.float32), be1=jnp.zeros((1, H1), jnp.float32),
        w2=w2, b2=b2, g2=jnp.ones((1, H2), jnp.float32), be2=jnp.zeros((1, H2), jnp.float32),
        w3=w3, b3=b3,
    )


def _batchnorm_train(h, gamma, beta):
    mu = jnp.mean(h, axis=0, keepdims=True)
    diff = h - mu
    var = jnp.mean(diff * diff, axis=0, keepdims=True)
    return diff * jax.lax.rsqrt(var + EPS) * gamma + beta


def reference_forward(x, p):
    """Pure-f32 JAX reference with identical semantics (training-mode BN)."""
    h = x @ p["w1"] + p["b1"]
    h = jnp.maximum(_batchnorm_train(h, p["g1"], p["be1"]), 0.0)
    h = h @ p["w2"] + p["b2"]
    h = jnp.maximum(_batchnorm_train(h, p["g2"], p["be2"]), 0.0)
    return h @ p["w3"] + p["b3"]


def reference_forward_kernel_math(x, p):
    """JAX reference that mirrors the kernel's precision (bf16 matmul operands, f32 BN)."""
    bf16, f32 = jnp.bfloat16, jnp.float32
    B = x.shape[0]

    def bn(hf, g, be):
        mu = jnp.sum(hf, 0) / B
        var = jnp.sum(hf * hf, 0) / B - mu * mu
        sc = g[0] * jax.lax.rsqrt(var + EPS)
        sh = be[0] - mu * sc
        return hf * sc + sh

    h1 = (jnp.dot(x.astype(bf16), p["w1"].astype(bf16), preferred_element_type=f32)
          + p["b1"]).astype(bf16).astype(f32)
    a1 = jnp.maximum(bn(h1, p["g1"], p["be1"]), 0.0).astype(bf16)
    h2 = (jnp.dot(a1, p["w2"].astype(bf16), preferred_element_type=f32)
          + p["b2"]).astype(bf16).astype(f32)
    a2 = jnp.maximum(bn(h2, p["g2"], p["be2"]), 0.0)
    return jnp.sum(a2 * p["w3"].reshape(1, H2), -1, keepdims=True) + p["b3"].reshape(1, 1)


if __name__ == "__main__":
    key = jax.random.PRNGKey(0)
    kx, kp = jax.random.split(key)

    B, TB = 256, 128          # small demo: 2 batch tiles, exercises the grid
    x = jax.random.normal(kx, (B, IN_F), jnp.float32)
    params = init_params(kp)

    fwd = jax.jit(lambda xx, pp: calibration_head(xx, pp, tb=TB))
    out = jax.block_until_ready(fwd(x, params))

    ref_match = reference_forward_kernel_math(x, params)   # same precision as kernel
    ref_f32 = reference_forward(x, params)                 # pure f32 semantics

    assert out.shape == (B, OUT_F)
    assert jnp.allclose(out, ref_match, atol=2e-3, rtol=2e-3), "mismatch vs precision-matched ref"
    assert jnp.allclose(out, ref_f32, atol=2.5e-1, rtol=2.5e-1), "mismatch vs f32 ref (bf16 drift)"

    print("KERNEL_OK")
</pallas_src>

<mosaic_0001>
module attributes {stable_mosaic.version = 11 : i64} {
  func.func @_stage1_kernel(%arg0: i32, %arg1: memref<128x46xf32, #tpu.memory_space<vmem>>, %arg2: memref<46x512xbf16, #tpu.memory_space<vmem>>, %arg3: memref<1x512xf32, #tpu.memory_space<vmem>>, %arg4: memref<128x512xbf16, #tpu.memory_space<vmem>>, %arg5: memref<8x512xf32, #tpu.memory_space<vmem>>) attributes {dimension_semantics = [#tpu.dimension_semantics<parallel>], iteration_bounds = array<i64: 2>, scalar_prefetch = 0 : i64, scratch_operands = 0 : i64, tpu.core_type = #tpu.core_type<tc>, window_params = [{transform_indices = @transform_0, window_bounds = array<i64: 128, 46>}, {pipeline_mode = #tpu.pipeline_mode<synchronous>, transform_indices = @transform_1, window_bounds = array<i64: 46, 512>}, {pipeline_mode = #tpu.pipeline_mode<synchronous>, transform_indices = @transform_2, window_bounds = array<i64: 1, 512>}, {transform_indices = @transform_3, window_bounds = array<i64: 128, 512>}, {transform_indices = @transform_4, window_bounds = array<i64: 8, 512>}]} {
    %c0 = arith.constant 0 : index
    %c0_0 = arith.constant 0 : index
    %0 = vector.load %arg1[%c0, %c0_0] : memref<128x46xf32, #tpu.memory_space<vmem>>, vector<128x46xf32>
    %1 = arith.truncf %0 : vector<128x46xf32> to vector<128x46xbf16>
    %c0_1 = arith.constant 0 : index
    %c0_2 = arith.constant 0 : index
    %2 = vector.load %arg2[%c0_1, %c0_2] : memref<46x512xbf16, #tpu.memory_space<vmem>>, vector<46x512xbf16>
    %cst = arith.constant dense<0.000000e+00> : vector<128x512xf32>
    %3 = tpu.matmul %1, %2, %cst {dimension_numbers = #tpu.dot_dimension_numbers<[1], [0], [0], [1], [0, 0, 1, 1], [], []>} : vector<128x46xbf16>, vector<46x512xbf16>, vector<128x512xf32> -> vector<128x512xf32>
    %c0_3 = arith.constant 0 : index
    %c0_4 = arith.constant 0 : index
    %4 = vector.load %arg3[%c0_3, %c0_4] : memref<1x512xf32, #tpu.memory_space<vmem>>, vector<1x512xf32>
    %5 = vector.broadcast %4 : vector<1x512xf32> to vector<128x512xf32>
    %6 = arith.addf %3, %5 : vector<128x512xf32>
    %7 = arith.truncf %6 : vector<128x512xf32> to vector<128x512xbf16>
    %c0_5 = arith.constant 0 : index
    %c0_6 = arith.constant 0 : index
    %8 = vector.load %arg4[%c0_5, %c0_6] : memref<128x512xbf16, #tpu.memory_space<vmem>>, vector<128x512xbf16>
    tpu.vector_store %arg4[%c0_5, %c0_6], %7 {strides = array<i32>} : memref<128x512xbf16, #tpu.memory_space<vmem>>, vector<128x512xbf16>,
    %9 = arith.extf %7 : vector<128x512xbf16> to vector<128x512xf32>
    %cst_7 = arith.constant dense<0.000000e+00> : vector<512xf32>
    %10 = vector.multi_reduction <add>, %9, %cst_7 [0] : vector<128x512xf32> to vector<512xf32>
    %11 = vector.shape_cast %10 : vector<512xf32> to vector<1x512xf32>
    %12 = arith.mulf %9, %9 : vector<128x512xf32>
    %cst_8 = arith.constant dense<0.000000e+00> : vector<512xf32>
    %13 = vector.multi_reduction <add>, %12, %cst_8 [0] : vector<128x512xf32> to vector<512xf32>
    %14 = vector.shape_cast %13 : vector<512xf32> to vector<1x512xf32>
    %15 = tpu.iota {dimensions = array<i32: 0>} : vector<8x512xi32>
    %c0_i32 = arith.constant 0 : i32
    %16 = vector.broadcast %c0_i32 : i32 to vector<8x512xi32>
    %17 = arith.cmpi eq, %15, %16 : vector<8x512xi32>
    %cst_9 = arith.constant 0.000000e+00 : f32
    %18 = vector.shape_cast %11 : vector<1x512xf32> to vector<1x512xf32>
    %19 = vector.broadcast %18 : vector<1x512xf32> to vector<8x512xf32>
    %20 = vector.broadcast %cst_9 : f32 to vector<8x512xf32>
    %21 = arith.select %17, %19, %20 : vector<8x512xi1>, vector<8x512xf32>
    %c1_i32 = arith.constant 1 : i32
    %22 = vector.broadcast %c1_i32 : i32 to vector<8x512xi32>
    %23 = arith.cmpi eq, %15, %22 : vector<8x512xi32>
    %cst_10 = arith.constant 0.000000e+00 : f32
    %24 = vector.shape_cast %14 : vector<1x512xf32> to vector<1x512xf32>
    %25 = vector.broadcast %24 : vector<1x512xf32> to vector<8x512xf32>
    %26 = vector.broadcast %cst_10 : f32 to vector<8x512xf32>
    %27 = arith.select %23, %25, %26 : vector<8x512xi1>, vector<8x512xf32>
    %28 = arith.addf %21, %27 : vector<8x512xf32>
    %c0_11 = arith.constant 0 : index
    %c0_12 = arith.constant 0 : index
    %29 = vector.load %arg5[%c0_11, %c0_12] : memref<8x512xf32, #tpu.memory_space<vmem>>, vector<8x512xf32>
    tpu.vector_store %arg5[%c0_11, %c0_12], %28 {strides = array<i32>} : memref<8x512xf32, #tpu.memory_space<vmem>>, vector<8x512xf32>,
    return
  }
  func.func @transform_0(%arg0: i32) -> (i32, i32) {
    %c0_i32 = arith.constant 0 : i32
    %c0_i32_0 = arith.constant 0 : i32
    return %arg0, %c0_i32 : i32, i32
  }
  func.func @transform_1(%arg0: i32) -> (i32, i32) {
    %c0_i32 = arith.constant 0 : i32
    %c0_i32_0 = arith.constant 0 : i32
    %c0_i32_1 = arith.constant 0 : i32
    return %c0_i32, %c0_i32_0 : i32, i32
  }
  func.func @transform_2(%arg0: i32) -> (i32, i32) {
    %c0_i32 = arith.constant 0 : i32
    %c0_i32_0 = arith.constant 0 : i32
    %c0_i32_1 = arith.constant 0 : i32
    return %c0_i32, %c0_i32_0 : i32, i32
  }
  func.func @transform_3(%arg0: i32) -> (i32, i32) {
    %c0_i32 = arith.constant 0 : i32
    %c0_i32_0 = arith.constant 0 : i32
    return %arg0, %c0_i32 : i32, i32
  }
  func.func @transform_4(%arg0: i32) -> (i32, i32) {
    %c0_i32 = arith.constant 0 : i32
    %c0_i32_0 = arith.constant 0 : i32
    return %arg0, %c0_i32 : i32, i32
  }
}

module attributes {stable_mosaic.version = 11 : i64} {
  func.func @_stage2_kernel(%arg0: i32, %arg1: memref<128x512xbf16, #tpu.memory_space<vmem>>, %arg2: memref<1x512xf32, #tpu.memory_space<vmem>>, %arg3: memref<1x512xf32, #tpu.memory_space<vmem>>, %arg4: memref<512x128xbf16, #tpu.memory_space<vmem>>, %arg5: memref<1x128xf32, #tpu.memory_space<vmem>>, %arg6: memref<128x128xbf16, #tpu.memory_space<vmem>>, %arg7: memref<8x128xf32, #tpu.memory_space<vmem>>) attributes {dimension_semantics = [#tpu.dimension_semantics<parallel>], iteration_bounds = array<i64: 2>, scalar_prefetch = 0 : i64, scratch_operands = 0 : i64, tpu.core_type = #tpu.core_type<tc>, window_params = [{transform_indices = @transform_0, window_bounds = array<i64: 128, 512>}, {pipeline_mode = #tpu.pipeline_mode<synchronous>, transform_indices = @transform_1, window_bounds = array<i64: 1, 512>}, {pipeline_mode = #tpu.pipeline_mode<synchronous>, transform_indices = @transform_2, window_bounds = array<i64: 1, 512>}, {pipeline_mode = #tpu.pipeline_mode<synchronous>, transform_indices = @transform_3, window_bounds = array<i64: 512, 128>}, {pipeline_mode = #tpu.pipeline_mode<synchronous>, transform_indices = @transform_4, window_bounds = array<i64: 1, 128>}, {transform_indices = @transform_5, window_bounds = array<i64: 128, 128>}, {transform_indices = @transform_6, window_bounds = array<i64: 8, 128>}]} {
    %c0 = arith.constant 0 : index
    %c0_0 = arith.constant 0 : index
    %0 = vector.load %arg1[%c0, %c0_0] : memref<128x512xbf16, #tpu.memory_space<vmem>>, vector<128x512xbf16>
    %1 = arith.extf %0 : vector<128x512xbf16> to vector<128x512xf32>
    %c0_1 = arith.constant 0 : index
    %c0_2 = arith.constant 0 : index
    %2 = vector.load %arg2[%c0_1, %c0_2] : memref<1x512xf32, #tpu.memory_space<vmem>>, vector<1x512xf32>
    %3 = vector.broadcast %2 : vector<1x512xf32> to vector<128x512xf32>
    %4 = arith.mulf %1, %3 : vector<128x512xf32>
    %c0_3 = arith.constant 0 : index
    %c0_4 = arith.constant 0 : index
    %5 = vector.load %arg3[%c0_3, %c0_4] : memref<1x512xf32, #tpu.memory_space<vmem>>, vector<1x512xf32>
    %6 = vector.broadcast %5 : vector<1x512xf32> to vector<128x512xf32>
    %7 = arith.addf %4, %6 : vector<128x512xf32>
    %cst = arith.constant 0.000000e+00 : f32
    %8 = vector.broadcast %cst : f32 to vector<128x512xf32>
    %9 = arith.maximumf %7, %8 : vector<128x512xf32>
    %10 = arith.truncf %9 : vector<128x512xf32> to vector<128x512xbf16>
    %c0_5 = arith.constant 0 : index
    %c0_6 = arith.constant 0 : index
    %11 = vector.load %arg4[%c0_5, %c0_6] : memref<512x128xbf16, #tpu.memory_space<vmem>>, vector<512x128xbf16>
    %cst_7 = arith.constant dense<0.000000e+00> : vector<128x128xf32>
    %12 = tpu.matmul %10, %11, %cst_7 {dimension_numbers = #tpu.dot_dimension_numbers<[1], [0], [0], [1], [0, 0, 1, 1], [], []>} : vector<128x512xbf16>, vector<512x128xbf16>, vector<128x128xf32> -> vector<128x128xf32>
    %c0_8 = arith.constant 0 : index
    %c0_9 = arith.constant 0 : index
    %13 = vector.load %arg5[%c0_8, %c0_9] : memref<1x128xf32, #tpu.memory_space<vmem>>, vector<1x128xf32>
    %14 = vector.broadcast %13 : vector<1x128xf32> to vector<128x128xf32>
    %15 = arith.addf %12, %14 : vector<128x128xf32>
    %16 = arith.truncf %15 : vector<128x128xf32> to vector<128x128xbf16>
    %c0_10 = arith.constant 0 : index
    %c0_11 = arith.constant 0 : index
    %17 = vector.load %arg6[%c0_10, %c0_11] : memref<128x128xbf16, #tpu.memory_space<vmem>>, vector<128x128xbf16>
    tpu.vector_store %arg6[%c0_10, %c0_11], %16 {strides = array<i32>} : memref<128x128xbf16, #tpu.memory_space<vmem>>, vector<128x128xbf16>,
    %18 = arith.extf %16 : vector<128x128xbf16> to vector<128x128xf32>
    %cst_12 = arith.constant dense<0.000000e+00> : vector<128xf32>
    %19 = vector.multi_reduction <add>, %18, %cst_12 [0] : vector<128x128xf32> to vector<128xf32>
    %20 = vector.shape_cast %19 : vector<128xf32> to vector<1x128xf32>
    %21 = arith.mulf %18, %18 : vector<128x128xf32>
    %cst_13 = arith.constant dense<0.000000e+00> : vector<128xf32>
    %22 = vector.multi_reduction <add>, %21, %cst_13 [0] : vector<128x128xf32> to vector<128xf32>
    %23 = vector.shape_cast %22 : vector<128xf32> to vector<1x128xf32>
    %24 = tpu.iota {dimensions = array<i32: 0>} : vector<8x128xi32>
    %c0_i32 = arith.constant 0 : i32
    %25 = vector.broadcast %c0_i32 : i32 to vector<8x128xi32>
    %26 = arith.cmpi eq, %24, %25 : vector<8x128xi32>
    %cst_14 = arith.constant 0.000000e+00 : f32
    %27 = vector.shape_cast %20 : vector<1x128xf32> to vector<1x128xf32>
    %28 = vector.broadcast %27 : vector<1x128xf32> to vector<8x128xf32>
    %29 = vector.broadcast %cst_14 : f32 to vector<8x128xf32>
    %30 = arith.select %26, %28, %29 : vector<8x128xi1>, vector<8x128xf32>
    %c1_i32 = arith.constant 1 : i32
    %31 = vector.broadcast %c1_i32 : i32 to vector<8x128xi32>
    %32 = arith.cmpi eq, %24, %31 : vector<8x128xi32>
    %cst_15 = arith.constant 0.000000e+00 : f32
    %33 = vector.shape_cast %23 : vector<1x128xf32> to vector<1x128xf32>
    %34 = vector.broadcast %33 : vector<1x128xf32> to vector<8x128xf32>
    %35 = vector.broadcast %cst_15 : f32 to vector<8x128xf32>
    %36 = arith.select %32, %34, %35 : vector<8x128xi1>, vector<8x128xf32>
    %37 = arith.addf %30, %36 : vector<8x128xf32>
    %c0_16 = arith.constant 0 : index
    %c0_17 = arith.constant 0 : index
    %38 = vector.load %arg7[%c0_16, %c0_17] : memref<8x128xf32, #tpu.memory_space<vmem>>, vector<8x128xf32>
    tpu.vector_store %arg7[%c0_16, %c0_17], %37 {strides = array<i32>} : memref<8x128xf32, #tpu.memory_space<vmem>>, vector<8x128xf32>,
    return
  }
  func.func @transform_0(%arg0: i32) -> (i32, i32) {
    %c0_i32 = arith.constant 0 : i32
    %c0_i32_0 = arith.constant 0 : i32
    return %arg0, %c0_i32 : i32, i32
  }
  func.func @transform_1(%arg0: i32) -> (i32, i32) {
    %c0_i32 = arith.constant 0 : i32
    %c0_i32_0 = arith.constant 0 : i32
    %c0_i32_1 = arith.constant 0 : i32
    return %c0_i32, %c0_i32_0 : i32, i32
  }
  func.func @transform_2(%arg0: i32) -> (i32, i32) {
    %c0_i32 = arith.constant 0 : i32
    %c0_i32_0 = arith.constant 0 : i32
    %c0_i32_1 = arith.constant 0 : i32
    return %c0_i32, %c0_i32_0 : i32, i32
  }
  func.func @transform_3(%arg0: i32) -> (i32, i32) {
    %c0_i32 = arith.constant 0 : i32
    %c0_i32_0 = arith.constant 0 : i32
    %c0_i32_1 = arith.constant 0 : i32
    return %c0_i32, %c0_i32_0 : i32, i32
  }
  func.func @transform_4(%arg0: i32) -> (i32, i32) {
    %c0_i32 = arith.constant 0 : i32
    %c0_i32_0 = arith.constant 0 : i32
    %c0_i32_1 = arith.constant 0 : i32
    return %c0_i32, %c0_i32_0 : i32, i32
  }
  func.func @transform_5(%arg0: i32) -> (i32, i32) {
    %c0_i32 = arith.constant 0 : i32
    %c0_i32_0 = arith.constant 0 : i32
    return %arg0, %c0_i32 : i32, i32
  }
  func.func @transform_6(%arg0: i32) -> (i32, i32) {
    %c0_i32 = arith.constant 0 : i32
    %c0_i32_0 = arith.constant 0 : i32
    return %arg0, %c0_i32 : i32, i32
  }
}

module attributes {stable_mosaic.version = 11 : i64} {
  func.func @_stage3_kernel(%arg0: i32, %arg1: memref<128x128xbf16, #tpu.memory_space<vmem>>, %arg2: memref<1x128xf32, #tpu.memory_space<vmem>>, %arg3: memref<1x128xf32, #tpu.memory_space<vmem>>, %arg4: memref<1x128xf32, #tpu.memory_space<vmem>>, %arg5: memref<1x1xf32, #tpu.memory_space<vmem>>, %arg6: memref<128x1xf32, #tpu.memory_space<vmem>>) attributes {dimension_semantics = [#tpu.dimension_semantics<parallel>], iteration_bounds = array<i64: 2>, scalar_prefetch = 0 : i64, scratch_operands = 0 : i64, tpu.core_type = #tpu.core_type<tc>, window_params = [{transform_indices = @transform_0, window_bounds = array<i64: 128, 128>}, {pipeline_mode = #tpu.pipeline_mode<synchronous>, transform_indices = @transform_1, window_bounds = array<i64: 1, 128>}, {pipeline_mode = #tpu.pipeline_mode<synchronous>, transform_indices = @transform_2, window_bounds = array<i64: 1, 128>}, {pipeline_mode = #tpu.pipeline_mode<synchronous>, transform_indices = @transform_3, window_bounds = array<i64: 1, 128>}, {pipeline_mode = #tpu.pipeline_mode<synchronous>, transform_indices = @transform_4, window_bounds = array<i64: 1, 1>}, {transform_indices = @transform_5, window_bounds = array<i64: 128, 1>}]} {
    %c0 = arith.constant 0 : index
    %c0_0 = arith.constant 0 : index
    %0 = vector.load %arg1[%c0, %c0_0] : memref<128x128xbf16, #tpu.memory_space<vmem>>, vector<128x128xbf16>
    %1 = arith.extf %0 : vector<128x128xbf16> to vector<128x128xf32>
    %c0_1 = arith.constant 0 : index
    %c0_2 = arith.constant 0 : index
    %2 = vector.load %arg2[%c0_1, %c0_2] : memref<1x128xf32, #tpu.memory_space<vmem>>, vector<1x128xf32>
    %3 = vector.broadcast %2 : vector<1x128xf32> to vector<128x128xf32>
    %4 = arith.mulf %1, %3 : vector<128x128xf32>
    %c0_3 = arith.constant 0 : index
    %c0_4 = arith.constant 0 : index
    %5 = vector.load %arg3[%c0_3, %c0_4] : memref<1x128xf32, #tpu.memory_space<vmem>>, vector<1x128xf32>
    %6 = vector.broadcast %5 : vector<1x128xf32> to vector<128x128xf32>
    %7 = arith.addf %4, %6 : vector<128x128xf32>
    %cst = arith.constant 0.000000e+00 : f32
    %8 = vector.broadcast %cst : f32 to vector<128x128xf32>
    %9 = arith.maximumf %7, %8 : vector<128x128xf32>
    %c0_5 = arith.constant 0 : index
    %c0_6 = arith.constant 0 : index
    %10 = vector.load %arg4[%c0_5, %c0_6] : memref<1x128xf32, #tpu.memory_space<vmem>>, vector<1x128xf32>
    %11 = vector.broadcast %10 : vector<1x128xf32> to vector<128x128xf32>
    %12 = arith.mulf %9, %11 : vector<128x128xf32>
    %cst_7 = arith.constant dense<0.000000e+00> : vector<128xf32>
    %13 = vector.multi_reduction <add>, %12, %cst_7 [1] : vector<128x128xf32> to vector<128xf32>
    %14 = vector.shape_cast %13 : vector<128xf32> to vector<128x1xf32>
    %c0_8 = arith.constant 0 : index
    %c0_9 = arith.constant 0 : index
    %15 = vector.load %arg5[%c0_8, %c0_9] : memref<1x1xf32, #tpu.memory_space<vmem>>, vector<1x1xf32>
    %16 = vector.broadcast %15 : vector<1x1xf32> to vector<128x1xf32>
    %17 = arith.addf %14, %16 : vector<128x1xf32>
    %c0_10 = arith.constant 0 : index
    %c0_11 = arith.constant 0 : index
    %18 = vector.load %arg6[%c0_10, %c0_11] : memref<128x1xf32, #tpu.memory_space<vmem>>, vector<128x1xf32>
    tpu.vector_store %arg6[%c0_10, %c0_11], %17 {strides = array<i32>} : memref<128x1xf32, #tpu.memory_space<vmem>>, vector<128x1xf32>,
    return
  }
  func.func @transform_0(%arg0: i32) -> (i32, i32) {
    %c0_i32 = arith.constant 0 : i32
    %c0_i32_0 = arith.constant 0 : i32
    return %arg0, %c0_i32 : i32, i32
  }
  func.func @transform_1(%arg0: i32) -> (i32, i32) {
    %c0_i32 = arith.constant 0 : i32
    %c0_i32_0 = arith.constant 0 : i32
    %c0_i32_1 = arith.constant 0 : i32
    return %c0_i32, %c0_i32_0 : i32, i32
  }
  func.func @transform_2(%arg0: i32) -> (i32, i32) {
    %c0_i32 = arith.constant 0 : i32
    %c0_i32_0 = arith.constant 0 : i32
    %c0_i32_1 = arith.constant 0 : i32
    return %c0_i32, %c0_i32_0 : i32, i32
  }
  func.func @transform_3(%arg0: i32) -> (i32, i32) {
    %c0_i32 = arith.constant 0 : i32
    %c0_i32_0 = arith.constant 0 : i32
    %c0_i32_1 = arith.constant 0 : i32
    return %c0_i32, %c0_i32_0 : i32, i32
  }
  func.func @transform_4(%arg0: i32) -> (i32, i32) {
    %c0_i32 = arith.constant 0 : i32
    %c0_i32_0 = arith.constant 0 : i32
    %c0_i32_1 = arith.constant 0 : i32
    return %c0_i32, %c0_i32_0 : i32, i32
  }
  func.func @transform_5(%arg0: i32) -> (i32, i32) {
    %c0_i32 = arith.constant 0 : i32
    %c0_i32_0 = arith.constant 0 : i32
    return %arg0, %c0_i32 : i32, i32
  }
}

</mosaic_0001>

<bundles_post_ra>
// kernel: _lambda_.5
= control target key start
LH: loop header
LB: loop body
LE: loop exit
PB: predicated region body
PF: predicated region fallthrough
CT: control target
= control target key end

     0   :  { %s578_s20 = smov 0   ;;  %s706_s0 = inlined_call_operand.vmem [shape: bf16[256,128], index: 0, kind: input, shape index: {}]   ;;  %s707_s1 = inlined_call_operand.vmem [shape: f32[1,128], index: 1, kind: input, shape index: {}]   ;;  %s708_s2 = inlined_call_operand.vmem [shape: f32[1,128], index: 2, kind: input, shape index: {}]   ;;  %s709_s3 = inlined_call_operand.vmem [shape: f32[1,128], index: 3, kind: input, shape index: {}]   ;;  %s710_s4 = inlined_call_operand.<no memory space> [shape: f32[1,1], index: 4, kind: input, shape index: {}]   ;;  %s711_s5 = inlined_call_operand.vmem [shape: f32[256,1], index: 5, kind: output, shape index: {}]  }
   0x1   :  { %v10_v0 = vstv %s710_s4 }
   0x2   :  { %11 = vst [vmem:[#allocation2] sm:$0x1] %v10_v0 }
   0x3 LB: > { %s475_s21 = sadd.s32 4294967295, %s543_s20   ;;  %p479_p0 = scmp.ge.s32.totalorder %s543_s20, 1  ;;  %s543_s20 = sphi %s578_s20, %s17_s20  }
   0x4   : > { %p190_p1 = scmp.lt.s32.totalorder %s543_s20, 3 }
   0x6   : > { %p191_p2 = pnand %p479_p0, %p190_p1 }
   0x7   : > { %s480_s22 = sshll.u32 (!%p191_p2), %s475_s21, 4  ;;  %v597_v1 = vld [vmem:[%s707_s1] ss:$0 sm:$0xff] (!%p191_p2)  ;;  %vm402_vm0 = vcmask (!%p191_p2), 7168  }
   0x8   : > { %194 = sbr.rel (%p191_p2) target bundleno = 202 (0xca), region = 40  ;;  %p219_p3 = scmp.lt.s32.totalorder (!%p191_p2), %s480_s22, 31  ;;  %v606_v10 = vld [vmem:[%s708_s2] ss:$0 sm:$0xff] (!%p191_p2) }
   0x9   : > { %v623_v27 = vld [vmem:[%s709_s3] ss:$0 sm:$0xff] (!%p191_p2) }
   0xf   : > { %s713_s22 = smov (!%p219_p3, %s480_s22), 31 }
  0x10   : > { %s481_s4 = sshll.u32 %s713_s22, 2  ;;  %s483_s7 = sshll.u32 %s713_s22, 3 }
  0x11   : > { %s592_s25 = scalar_lea.vmem %s706_s0, %s481_s4  ;;  %s669_s10 = scalar_lea.vmem %s711_s5, %s483_s7 }
  0x12   : > { %v522_v2 = vld [vmem:[%s592_s25 + $0x8] sm:$0xff]   ;;  %v491_v3 = vld [vmem:[%s592_s25] sm:$0xff]   ;;  %v523_v4 = vld [vmem:[%s592_s25 + $0x10] sm:$0xff]  }
  0x13   : > { %v496_v5 = vunpack.c.l.bf16 %v522_v2  ;;  %v492_v6 = vunpack.c.l.bf16 %v491_v3  ;;  %v497_v7 = vunpack.c.h.bf16 %v522_v2  ;;  %v493_v8 = vunpack.c.h.bf16 %v491_v3  ;;  %v524_v9 = vld [vmem:[%s592_s25 + $0x18] sm:$0xff]   ;;  %v525_v35 = vld [vmem:[%s592_s25 + $0x20] sm:$0xff]   ;;  %v526_v36 = vld [vmem:[%s592_s25 + $0x28] sm:$0xff]  }
  0x14   : > { %v501_v11 = vunpack.c.h.bf16 %v523_v4  ;;  %v500_v12 = vunpack.c.l.bf16 %v523_v4  ;;  %v505_v13 = vunpack.c.h.bf16 %v524_v9  ;;  %v504_v14 = vunpack.c.l.bf16 %v524_v9  ;;  %v527_v48 = vld [vmem:[%s592_s25 + $0x30] sm:$0xff]   ;;  %v528_v61 = vld [vmem:[%s592_s25 + $0x38] sm:$0xff]  }
  0x15   : > { %v271_v15 = vmul.f32 %v496_v5, %v597_v1  ;;  %v269_v16 = vmul.f32 %v492_v6, %v597_v1  ;;  %v272_v17 = vmul.f32 %v497_v7, %v597_v1  ;;  %v270_v18 = vmul.f32 %v493_v8, %v597_v1 }
  0x16   : > { %v274_v19 = vmul.f32 %v501_v11, %v597_v1  ;;  %v273_v20 = vmul.f32 %v500_v12, %v597_v1  ;;  %v276_v21 = vmul.f32 %v505_v13, %v597_v1  ;;  %v275_v22 = vmul.f32 %v504_v14, %v597_v1 }
  0x17   : > { %v294_v23 = vadd.f32 %v606_v10, %v271_v15  ;;  %v292_v24 = vadd.f32 %v606_v10, %v269_v16  ;;  %v295_v25 = vadd.f32 %v606_v10, %v272_v17  ;;  %v293_v26 = vadd.f32 %v606_v10, %v270_v18 }
  0x18   : > { %v297_v28 = vadd.f32 %v606_v10, %v274_v19  ;;  %v296_v29 = vadd.f32 %v606_v10, %v273_v20  ;;  %v299_v34 = vadd.f32 %v606_v10, %v276_v21  ;;  %v298_v40 = vadd.f32 %v606_v10, %v275_v22 }
  0x19   : > { %v310_v30 = vmax.f32 %v294_v23, 0.0  ;;  %v308_v31 = vmax.f32 %v292_v24, 0.0  ;;  %v311_v32 = vmax.f32 %v295_v25, 0.0  ;;  %v309_v33 = vmax.f32 %v293_v26, 0.0 }
  0x1a   : > { %v313_v39 = vmax.f32 %v297_v28, 0.0  ;;  %v312_v43 = vmax.f32 %v296_v29, 0.0  ;;  %v509_v44 = vunpack.c.h.bf16 %v525_v35  ;;  %v508_v45 = vunpack.c.l.bf16 %v525_v35  ;;  %v487_v29 = vld [vmem:[#allocation2] ss:$0 sm:$0xff] }
  0x1b   : > { %v333_v37 = vmul.f32 %v623_v27, %v310_v30  ;;  %v331_v38 = vmul.f32 %v623_v27, %v308_v31  ;;  %v334_v41 = vmul.f32 %v623_v27, %v311_v32  ;;  %v332_v42 = vmul.f32 %v623_v27, %v309_v33 }
  0x1c   : > { %v513_v46 = vunpack.c.h.bf16 %v526_v36  ;;  %v512_v47 = vunpack.c.l.bf16 %v526_v36  ;;  %v315_v49 = vmax.f32 %v299_v34, 0.0  ;;  %v336_v50 = vmul.f32 %v623_v27, %v313_v39 }
  0x1d   : > { %351 = vadd.xlane.f32.xlu1 %v333_v37  ;;  %347 = vadd.xlane.f32.xlu0 %v331_v38  ;;  %v314_v51 = vmax.f32 %v298_v40, 0.0  ;;  %v278_v52 = vmul.f32 %v509_v44, %v597_v1  ;;  %v277_v53 = vmul.f32 %v508_v45, %v597_v1  ;;  %v335_v54 = vmul.f32 %v623_v27, %v312_v43 }
  0x1e   : > { %v280_v55 = vmul.f32 %v513_v46, %v597_v1  ;;  %v517_v56 = vunpack.c.h.bf16 %v527_v48  ;;  %v516_v57 = vunpack.c.l.bf16 %v527_v48  ;;  %v279_v60 = vmul.f32 %v512_v47, %v597_v1 }
  0x1f   : > { %v301_v58 = vadd.f32 %v606_v10, %v278_v52  ;;  %v300_v59 = vadd.f32 %v606_v10, %v277_v53  ;;  %v338_v62 = vmul.f32 %v623_v27, %v315_v49  ;;  %v337_v63 = vmul.f32 %v623_v27, %v314_v51 }
  0x20   : > { %v282_v0 = vmul.f32 %v517_v56, %v597_v1  ;;  %v281_v2 = vmul.f32 %v516_v57, %v597_v1  ;;  %v521_v3 = vunpack.c.h.bf16 %v528_v61  ;;  %v520_v4 = vunpack.c.l.bf16 %v528_v61 }
  0x21   : > { %353 = vadd.xlane.f32.xlu1 %v334_v41  ;;  %349 = vadd.xlane.f32.xlu0 %v332_v42  ;;  %v317_v5 = vmax.f32 %v301_v58, 0.0  ;;  %v316_v6 = vmax.f32 %v300_v59, 0.0  ;;  %v303_v7 = vadd.f32 %v606_v10, %v280_v55  ;;  %v302_v8 = vadd.f32 %v606_v10, %v279_v60 }
  0x22   : > { %v305_v9 = vadd.f32 %v606_v10, %v282_v0  ;;  %v304_v11 = vadd.f32 %v606_v10, %v281_v2  ;;  %v284_v12 = vmul.f32 %v521_v3, %v597_v1  ;;  %v283_v13 = vmul.f32 %v520_v4, %v597_v1 }
  0x23   : > { %v340_v14 = vmul.f32 %v623_v27, %v317_v5  ;;  %v339_v15 = vmul.f32 %v623_v27, %v316_v6  ;;  %v319_v16 = vmax.f32 %v303_v7, 0.0  ;;  %v318_v17 = vmax.f32 %v302_v8, 0.0 }
  0x24   : > { %v307_v18 = vadd.f32 %v606_v10, %v284_v12  ;;  %v306_v19 = vadd.f32 %v606_v10, %v283_v13  ;;  %v321_v1 = vmax.f32 %v305_v9, 0.0  ;;  %v320_v22 = vmax.f32 %v304_v11, 0.0 }
  0x25   : > { %357 = vadd.xlane.f32.xlu1 %v336_v50  ;;  %355 = vadd.xlane.f32.xlu0 %v335_v54  ;;  %v342_v20 = vmul.f32 %v623_v27, %v319_v16  ;;  %v341_v21 = vmul.f32 %v623_v27, %v318_v17 }
  0x26   : > { %v344_v23 = vmul.f32 %v623_v27, %v321_v1  ;;  %v343_v24 = vmul.f32 %v623_v27, %v320_v22  ;;  %v323_v25 = vmax.f32 %v307_v18, 0.0  ;;  %v322_v26 = vmax.f32 %v306_v19, 0.0 }
  0x28   : > { %v346_v10 = vmul.f32 %v623_v27, %v323_v25  ;;  %v345_v28 = vmul.f32 %v623_v27, %v322_v26 }
  0x29   : > { %361 = vadd.xlane.f32.xlu1 %v338_v62  ;;  %359 = vadd.xlane.f32.xlu0 %v337_v63 }
  0x2d   : > { %365 = vadd.xlane.f32.xlu1 %v340_v14  ;;  %363 = vadd.xlane.f32.xlu0 %v339_v15 }
  0x31   : > { %369 = vadd.xlane.f32.xlu1 %v342_v20  ;;  %367 = vadd.xlane.f32.xlu0 %v341_v21 }
  0x35   : > { %373 = vadd.xlane.f32.xlu1 %v344_v23  ;;  %371 = vadd.xlane.f32.xlu0 %v343_v24 }
  0x39   : > { %377 = vadd.xlane.f32.xlu1 %v346_v10  ;;  %375 = vadd.xlane.f32.xlu0 %v345_v28 }
  0xaa   : > { %v352_v30 = vpop.xlane.xlu1 %351  ;;  %v348_v31 = vpop.xlane.xlu0 %347 }
  0xab   : > { %v388_v32 = vadd.f32 %v487_v29, %v352_v30  ;;  %v386_v27 = vadd.f32 %v487_v29, %v348_v31 }
  0xad   : > { %405 = vst.msk [vmem:[%s669_s10 + $0x10] sm:$0xff] %vm402_vm0, %v388_v32  ;;  %403 = vst.msk [vmem:[%s669_s10] sm:$0xff] %vm402_vm0, %v386_v27 }
  0xae   : > { %v354_v33 = vpop.xlane.xlu1 %353  ;;  %v350_v34 = vpop.xlane.xlu0 %349 }
  0xaf   : > { %v389_v35 = vadd.f32 %v487_v29, %v354_v33  ;;  %v387_v36 = vadd.f32 %v487_v29, %v350_v34 }
  0xb1   : > { %406 = vst.msk [vmem:[%s669_s10 + $0x18] sm:$0xff] %vm402_vm0, %v389_v35  ;;  %404 = vst.msk [vmem:[%s669_s10 + $0x8] sm:$0xff] %vm402_vm0, %v387_v36 }
  0xb2   : > { %v358_v37 = vpop.xlane.xlu1 %357  ;;  %v356_v38 = vpop.xlane.xlu0 %355 }
  0xb3   : > { %v391_v39 = vadd.f32 %v487_v29, %v358_v37  ;;  %v390_v40 = vadd.f32 %v487_v29, %v356_v38 }
  0xb5   : > { %408 = vst.msk [vmem:[%s669_s10 + $0x28] sm:$0xff] %vm402_vm0, %v391_v39  ;;  %407 = vst.msk [vmem:[%s669_s10 + $0x20] sm:$0xff] %vm402_vm0, %v390_v40 }
  0xb6   : > { %v362_v41 = vpop.xlane.xlu1 %361  ;;  %v360_v42 = vpop.xlane.xlu0 %359 }
  0xb7   : > { %v393_v43 = vadd.f32 %v487_v29, %v362_v41  ;;  %v392_v44 = vadd.f32 %v487_v29, %v360_v42 }
  0xb9   : > { %410 = vst.msk [vmem:[%s669_s10 + $0x38] sm:$0xff] %vm402_vm0, %v393_v43  ;;  %409 = vst.msk [vmem:[%s669_s10 + $0x30] sm:$0xff] %vm402_vm0, %v392_v44 }
  0xba   : > { %v366_v45 = vpop.xlane.xlu1 %365  ;;  %v364_v46 = vpop.xlane.xlu0 %363 }
  0xbb   : > { %v395_v47 = vadd.f32 %v487_v29, %v366_v45  ;;  %v394_v48 = vadd.f32 %v487_v29, %v364_v46 }
  0xbd   : > { %412 = vst.msk [vmem:[%s669_s10 + $0x48] sm:$0xff] %vm402_vm0, %v395_v47  ;;  %411 = vst.msk [vmem:[%s669_s10 + $0x40] sm:$0xff] %vm402_vm0, %v394_v48 }
  0xbe   : > { %v370_v49 = vpop.xlane.xlu1 %369  ;;  %v368_v50 = vpop.xlane.xlu0 %367 }
  0xbf   : > { %v397_v51 = vadd.f32 %v487_v29, %v370_v49  ;;  %v396_v52 = vadd.f32 %v487_v29, %v368_v50 }
  0xc1   : > { %414 = vst.msk [vmem:[%s669_s10 + $0x58] sm:$0xff] %vm402_vm0, %v397_v51  ;;  %413 = vst.msk [vmem:[%s669_s10 + $0x50] sm:$0xff] %vm402_vm0, %v396_v52 }
  0xc2   : > { %v374_v53 = vpop.xlane.xlu1 %373  ;;  %v372_v54 = vpop.xlane.xlu0 %371 }
  0xc3   : > { %v399_v55 = vadd.f32 %v487_v29, %v374_v53  ;;  %v398_v56 = vadd.f32 %v487_v29, %v372_v54 }
  0xc5   : > { %416 = vst.msk [vmem:[%s669_s10 + $0x68] sm:$0xff] %vm402_vm0, %v399_v55  ;;  %415 = vst.msk [vmem:[%s669_s10 + $0x60] sm:$0xff] %vm402_vm0, %v398_v56 }
  0xc6   : > { %v378_v57 = vpop.xlane.xlu1 %377  ;;  %v376_v58 = vpop.xlane.xlu0 %375 }
  0xc7   : > { %v401_v59 = vadd.f32 %v487_v29, %v378_v57  ;;  %v400_v60 = vadd.f32 %v487_v29, %v376_v58 }
  0xc9   : > { %418 = vst.msk [vmem:[%s669_s10 + $0x78] sm:$0xff] %vm402_vm0, %v401_v59  ;;  %417 = vst.msk [vmem:[%s669_s10 + $0x70] sm:$0xff] %vm402_vm0, %v400_v60 }
  0xca PF: > { %s17_s20 = sadd.s32 1, %s543_s20  }
  0xcb   : > { %p14_p4 = scmp.ge.s32.totalorder %s17_s20, 4  }
  0xcd   :  { %16 = sbr.rel (!%p14_p4) target bundleno = 3 (0x3), region = 70 }

// kernel: _lambda_.3
= control target key start
LH: loop header
LB: loop body
LE: loop exit
PB: predicated region body
PF: predicated region fallthrough
CT: control target
= control target key end

     0   :  { %s1397_s15 = smov 0   ;;  %s1751_s0 = inlined_call_operand.vmem [shape: f32[256,46], index: 0, kind: input, shape index: {}]   ;;  %s1752_s1 = inlined_call_operand.vmem [shape: bf16[46,512], index: 1, kind: input, shape index: {}]   ;;  %s1753_s2 = inlined_call_operand.vmem [shape: f32[1,512], index: 2, kind: input, shape index: {}]   ;;  %s1754_s3 = inlined_call_operand.vmem [shape: bf16[256,512], index: 3, kind: output, shape index: {0}]   ;;  %s1755_s4 = inlined_call_operand.vmem [shape: f32[16,512], index: 4, kind: output, shape index: {1}]  }
   0x1 LB: > { %s1403_s16 = sadd.s32 4294967295, %s1369_s15   ;;  %p1230_p0 = scmp.ge.s32.totalorder %s1369_s15, 1  ;;  %s1369_s15 = sphi %s1397_s15, %s15_s15  }
   0x2   : > { %p166_p1 = scmp.lt.s32.totalorder %s1369_s15, 3 }
   0x4   : > { %p167_p2 = pnand %p1230_p0, %p166_p1 }
   0x5   : > { %v1345_v0 = vld [vmem:[%s1752_s1 + $0x4] ss:$16 sps:$4 sm:$0xff] (!%p167_p2)   ;;  %v1347_v1 = vld [vmem:[%s1752_s1 + $0xc] ss:$16 sps:$4 sm:$0xff] (!%p167_p2)   ;;  %v1371_v2 = vmov (!%p167_p2), 0   ;;  %s1231_s21 = sshll.u32 (!%p167_p2), %s1403_s16, 4  ;;  %v255_v39 = vlaneseq (!%p167_p2) }
   0x6   : > { %170 = sbr.rel (%p167_p2) target bundleno = 350 (0x15e), region = 32  ;;  %401 = vmatprep.mubr.bf16.mxu0 (!%p167_p2), %v1371_v2  ;;  %514 = vmatprep.mubr.bf16.mxu1 (!%p167_p2), %v1371_v2  ;;  %v1349_v3 = vld [vmem:[%s1752_s1] ss:$16 sps:$4 sm:$0xff] (!%p167_p2)   ;;  %v1350_v4 = vld [vmem:[%s1752_s1 + $0x8] ss:$16 sps:$4 sm:$0xff] (!%p167_p2)   ;;  %p199_p3 = scmp.lt.s32.totalorder (!%p167_p2), %s1231_s21, 31 }
   0x7   : > { %369 = vmatprep.subr.bf16.mxu0 (!%p167_p2), %v1345_v0  ;;  %482 = vmatprep.subr.bf16.mxu1 (!%p167_p2), %v1347_v1  ;;  %v1351_v5 = vld [vmem:[%s1752_s1 + $0x24] ss:$16 sps:$4 sm:$0xff] (!%p167_p2)   ;;  %v1353_v6 = vld [vmem:[%s1752_s1 + $0x2c] ss:$16 sps:$4 sm:$0xff] (!%p167_p2)   ;;  %v1355_v7 = vld [vmem:[%s1752_s1 + $0x20] ss:$16 sps:$4 sm:$0xff] (!%p167_p2)  }
   0x8   : > { %370 = vmatpush1.bf16.msra.mxu0 (!%p167_p2), %v1349_v3  ;;  %483 = vmatpush1.bf16.msra.mxu1 (!%p167_p2), %v1350_v4  ;;  %v1356_v8 = vld [vmem:[%s1752_s1 + $0x28] ss:$16 sps:$4 sm:$0xff] (!%p167_p2)   ;;  %vm356_vm0 = vcmask (!%p167_p2), 1046528   ;;  %v1357_v9 = vld [vmem:[%s1752_s1 + $0x44] ss:$16 sps:$4 sm:$0x7f] (!%p167_p2)  }
   0x9   : > { %371 = vmatprep.subr.bf16.mxu0 (!%p167_p2), %v1351_v5  ;;  %484 = vmatprep.subr.bf16.mxu1 (!%p167_p2), %v1353_v6  ;;  %v1359_v10 = vld [vmem:[%s1752_s1 + $0x4c] ss:$16 sps:$4 sm:$0x7f] (!%p167_p2)   ;;  %v1361_v11 = vld [vmem:[%s1752_s1 + $0x40] ss:$16 sps:$4 sm:$0x7f] (!%p167_p2)  }
   0xa   : > { %v1362_v12 = vld [vmem:[%s1752_s1 + $0x48] ss:$16 sps:$4 sm:$0x7f] (!%p167_p2)   ;;  %v358_v13 = vsel (!%p167_p2), %vm356_vm0, %v1361_v11, 0  ;;  %vm331_vm1 = vcmask (!%p167_p2), 375808   ;;  %v1500_v40 = vshrl.u32 (!%p167_p2), %v255_v39, 7 }
   0xb   : > { %v364_v14 = vsel (!%p167_p2), %vm356_vm0, %v1362_v12, 0  ;;  %v253_v43 = vld [vmem:[%s1753_s2] sm:$0xf] (!%p167_p2)  ;;  %p211_p4 = scmp.lt.s32.totalorder (!%p167_p2), %s1403_s16, 1 }
   0xc   : > { %372 = vmatpush1.bf16.msra.mxu0 (!%p167_p2), %v1355_v7  ;;  %485 = vmatpush1.bf16.msra.mxu1 (!%p167_p2), %v1356_v8  ;;  %v257_v41 = vsub.s32 (!%p167_p2), 0, %v1500_v40  ;;  %v265_v42 = vsub.s32 (!%p167_p2), 2, %v1500_v40  ;;  %v261_v44 = vsub.s32 (!%p167_p2), 1, %v1500_v40  ;;  %v269_v45 = vsub.s32 (!%p167_p2), 3, %v1500_v40 }
   0xd   : > { %s1757_s21 = smov (!%p199_p3, %s1231_s21), 31  ;;  %1250 = vmatprep.subr.msk.bf16.mxu0 %vm356_vm0, %v1357_v9  ;;  %1259 = vmatprep.subr.msk.bf16.mxu1 %vm356_vm0, %v1359_v10  ;;  %vm1117_vm2 = vcmp.eq.s32.totalorder %v1500_v40, 0  ;;  %s1759_s16 = smov (!%p211_p4, %s1403_s16), 1  ;;  %vm1122_vm3 = vcmp.eq.s32.totalorder %v1500_v40, 1 }
   0xe   : > { %s1232_s18 = sshll.u32 %s1757_s21, 3  ;;  %v1509_v46 = vrot.slane %v253_v43, %v257_v41  ;;  %v1511_v47 = vrot.slane %v253_v43, %v265_v42  ;;  %v1513_v48 = vrot.slane %v253_v43, %v261_v44  ;;  %v1515_v49 = vrot.slane %v253_v43, %v269_v45  ;;  %s1302_s25 = sshll.u32 %s1757_s21, 4 }
   0xf   : > { %s1452_s22 = scalar_lea.vmem %s1751_s0, %s1232_s18  ;;  %s1525_s28 = scalar_lea.vmem %s1754_s3, %s1302_s25 }
  0x10   : > { %v217_v15 = vld [vmem:[%s1452_s22] sm:$0xff]  ;;  %v218_v16 = vld [vmem:[%s1452_s22 + $0x8] sm:$0xff]  ;;  %374 = vmatpush1.bf16.msra.mxu0 %v358_v13  ;;  %487 = vmatpush1.bf16.msra.mxu1 %v364_v14  ;;  %v219_v18 = vld [vmem:[%s1452_s22 + $0x10] sm:$0xff]  ;;  %s1303_s21 = sshll.u32 %s1759_s16, 5 }
  0x11   : > { %v233_v17 = vpack.c.bf16 %v218_v16, %v217_v15  ;;  %v220_v19 = vld [vmem:[%s1452_s22 + $0x18] sm:$0xff]  ;;  %v221_v21 = vld [vmem:[%s1452_s22 + $0x20] sm:$0xff]  ;;  %v222_v22 = vld [vmem:[%s1452_s22 + $0x28] sm:$0xff]  ;;  %s215_s5 = scalar_lea.vmem %s1755_s4, %s1303_s21 }
  0x12   : > { %v234_v20 = vpack.c.bf16 %v220_v19, %v219_v18  ;;  %v235_v23 = vpack.c.bf16 %v222_v22, %v221_v21  ;;  %v223_v24 = vld [vmem:[%s1452_s22 + $0x30] sm:$0xff]  ;;  %v224_v25 = vld [vmem:[%s1452_s22 + $0x38] sm:$0xff]  ;;  %v225_v27 = vld [vmem:[%s1452_s22 + $0x40] sm:$0xff] }
  0x13   : > { %1251 = vmatmul.mubr.msk.bf16.vlgmr.msra.gmra.mrb[0].mxu0 %vm331_vm1, %v233_v17  ;;  %1260 = vmatmul.mubr.msk.bf16.vlgmr.msra.gmra.mrb[0].mxu1 %vm331_vm1, %v233_v17  ;;  %v236_v26 = vpack.c.bf16 %v224_v25, %v223_v24  ;;  %v226_v28 = vld [vmem:[%s1452_s22 + $0x48] sm:$0xff]  ;;  %v227_v30 = vld [vmem:[%s1452_s22 + $0x50] sm:$0xff]  ;;  %v228_v31 = vld [vmem:[%s1452_s22 + $0x58] sm:$0xff] }
  0x14   : > { %411 = vmatprep.mubr.bf16.mxu0 %v1371_v2  ;;  %524 = vmatprep.mubr.bf16.mxu1 %v1371_v2  ;;  %v237_v29 = vpack.c.bf16 %v226_v28, %v225_v27  ;;  %v238_v32 = vpack.c.bf16 %v228_v31, %v227_v30  ;;  %v229_v33 = vld [vmem:[%s1452_s22 + $0x60] sm:$0xff]  ;;  %v230_v34 = vld [vmem:[%s1452_s22 + $0x68] sm:$0xff]  ;;  %v231_v36 = vld [vmem:[%s1452_s22 + $0x70] sm:$0xff] }
  0x15   : > { %v239_v35 = vpack.c.bf16 %v230_v34, %v229_v33  ;;  %v232_v37 = vld [vmem:[%s1452_s22 + $0x78] sm:$0xff] }
  0x16   : > { %v240_v38 = vpack.c.bf16 %v232_v37, %v231_v36 }
  0x1b   : > { %1252 = vmatmul.mubr.msk.bf16.gmra.mrb[4].mxu0 %vm331_vm1, %v234_v20  ;;  %1261 = vmatmul.mubr.msk.bf16.gmra.mrb[4].mxu1 %vm331_vm1, %v234_v20 }
  0x1c   : > { %421 = vmatprep.mubr.bf16.mxu0 %v1371_v2  ;;  %534 = vmatprep.mubr.bf16.mxu1 %v1371_v2 }
  0x23   : > { %1253 = vmatmul.mubr.msk.bf16.gmra.mrb[8].mxu0 %vm331_vm1, %v235_v23  ;;  %1262 = vmatmul.mubr.msk.bf16.gmra.mrb[8].mxu1 %vm331_vm1, %v235_v23 }
  0x24   : > { %431 = vmatprep.mubr.bf16.mxu0 %v1371_v2  ;;  %544 = vmatprep.mubr.bf16.mxu1 %v1371_v2 }
  0x2b   : > { %1254 = vmatmul.mubr.msk.bf16.gmra.mrb[12].mxu0 %vm331_vm1, %v236_v26  ;;  %1263 = vmatmul.mubr.msk.bf16.gmra.mrb[12].mxu1 %vm331_vm1, %v236_v26 }
  0x2c   : > { %441 = vmatprep.mubr.bf16.mxu0 %v1371_v2  ;;  %554 = vmatprep.mubr.bf16.mxu1 %v1371_v2 }
  0x33   : > { %1255 = vmatmul.mubr.msk.bf16.gmra.mrb[16].mxu0 %vm331_vm1, %v237_v29  ;;  %1264 = vmatmul.mubr.msk.bf16.gmra.mrb[16].mxu1 %vm331_vm1, %v237_v29 }
  0x34   : > { %451 = vmatprep.mubr.bf16.mxu0 %v1371_v2  ;;  %564 = vmatprep.mubr.bf16.mxu1 %v1371_v2 }
  0x3b   : > { %1256 = vmatmul.mubr.msk.bf16.gmra.mrb[20].mxu0 %vm331_vm1, %v238_v32  ;;  %1265 = vmatmul.mubr.msk.bf16.gmra.mrb[20].mxu1 %vm331_vm1, %v238_v32 }
  0x3c   : > { %461 = vmatprep.mubr.bf16.mxu0 %v1371_v2  ;;  %574 = vmatprep.mubr.bf16.mxu1 %v1371_v2 }
  0x43   : > { %1257 = vmatmul.mubr.msk.bf16.gmra.mrb[24].mxu0 %vm331_vm1, %v239_v35  ;;  %1266 = vmatmul.mubr.msk.bf16.gmra.mrb[24].mxu1 %vm331_vm1, %v239_v35 }
  0x44   : > { %471 = vmatprep.mubr.bf16.mxu0 %v1371_v2  ;;  %584 = vmatprep.mubr.bf16.mxu1 %v1371_v2 }
  0x4b   : > { %1258 = vmatmul.mubr.msk.bf16.gmra.mrb[28].mxu0 %vm331_vm1, %v240_v38  ;;  %1267 = vmatmul.mubr.msk.bf16.gmra.mrb[28].mxu1 %vm331_vm1, %v240_v38 }
  0xe6   : > { %v403_v50 = vpop.f32.mrb[0].mxu0  ;;  %v516_v51 = vpop.f32.mrb[0].mxu1 }
  0xe7   : > { %v404_v52 = vadd.f32 %v403_v50, %v1509_v46  ;;  %v517_v53 = vadd.f32 %v516_v51, %v1511_v47  ;;  %v405_v54 = vpop.f32.mrb[1].mxu0  ;;  %v518_v55 = vpop.f32.mrb[1].mxu1 }
  0xe8   : > { %v406_v56 = vadd.f32 %v405_v54, %v1513_v48  ;;  %v519_v57 = vadd.f32 %v518_v55, %v1515_v49  ;;  %v407_v58 = vpop.f32.mrb[2].mxu0  ;;  %v520_v59 = vpop.f32.mrb[2].mxu1 }
  0xe9   : > { %v408_v60 = vadd.f32 %v407_v58, %v1509_v46  ;;  %v521_v61 = vadd.f32 %v520_v59, %v1511_v47  ;;  %v409_v62 = vpop.f32.mrb[3].mxu0  ;;  %v522_v63 = vpop.f32.mrb[3].mxu1 }
  0xea   : > { %v1304_v0 = vpack.c.bf16 %v406_v56, %v404_v52  ;;  %v1305_v1 = vpack.c.bf16 %v519_v57, %v517_v53  ;;  %v410_v2 = vadd.f32 %v409_v62, %v1513_v48  ;;  %v523_v3 = vadd.f32 %v522_v63, %v1515_v49 }
  0xeb   : > { %v595_v4 = vpack.c.bf16 %v408_v60, %v404_v52  ;;  %v597_v5 = vpack.c.bf16 %v521_v61, %v517_v53 }
  0xec   : > { %787 = vst [vmem:[%s1525_s28] sm:$0xff] %v1304_v0  ;;  %788 = vst [vmem:[%s1525_s28 + $0x8] sm:$0xff] %v1305_v1  ;;  %v596_v6 = vpack.c.bf16 %v410_v2, %v406_v56  ;;  %v1306_v7 = vpack.c.bf16 %v410_v2, %v408_v60  ;;  %v598_v8 = vpack.c.bf16 %v523_v3, %v519_v57 }
  0xed   : > { %v1307_v9 = vpack.c.bf16 %v523_v3, %v521_v61  ;;  %v819_v10 = vunpack.c.l.bf16 %v595_v4  ;;  %v823_v11 = vunpack.c.h.bf16 %v595_v4  ;;  %v821_v12 = vunpack.c.l.bf16 %v597_v5 }
  0xee   : > { %v825_v13 = vunpack.c.h.bf16 %v597_v5  ;;  %789 = vst [vmem:[%s1525_s28 + $0x10] sm:$0xff] %v1306_v7  ;;  %v820_v14 = vunpack.c.l.bf16 %v596_v6  ;;  %v824_v15 = vunpack.c.h.bf16 %v596_v6  ;;  %v822_v16 = vunpack.c.l.bf16 %v598_v8  ;;  %v413_v18 = vpop.f32.mrb[4].mxu0  ;;  %v526_v19 = vpop.f32.mrb[4].mxu1 }
  0xef   : > { %790 = vst [vmem:[%s1525_s28 + $0x18] sm:$0xff] %v1307_v9  ;;  %v826_v17 = vunpack.c.h.bf16 %v598_v8  ;;  %v883_v20 = vadd.f32 %v823_v11, %v819_v10  ;;  %v967_v21 = vmul.f32 %v819_v10, %v819_v10  ;;  %v971_v22 = vmul.f32 %v823_v11, %v823_v11  ;;  %v415_v23 = vpop.f32.mrb[5].mxu0  ;;  %v528_v24 = vpop.f32.mrb[5].mxu1 }
  0xf0   : > { %v925_v25 = vadd.f32 %v825_v13, %v821_v12  ;;  %v969_v26 = vmul.f32 %v821_v12, %v821_v12  ;;  %v973_v27 = vmul.f32 %v825_v13, %v825_v13  ;;  %v968_v28 = vmul.f32 %v820_v14, %v820_v14  ;;  %v417_v29 = vpop.f32.mrb[6].mxu0  ;;  %v530_v30 = vpop.f32.mrb[6].mxu1 }
  0xf1   : > { %v1031_v31 = vadd.f32 %v971_v22, %v967_v21  ;;  %v904_v32 = vadd.f32 %v824_v15, %v820_v14  ;;  %v972_v33 = vmul.f32 %v824_v15, %v824_v15  ;;  %v970_v34 = vmul.f32 %v822_v16, %v822_v16  ;;  %v419_v35 = vpop.f32.mrb[7].mxu0  ;;  %v532_v36 = vpop.f32.mrb[7].mxu1 }
  0xf2   : > { %v946_v37 = vadd.f32 %v826_v17, %v822_v16  ;;  %v974_v38 = vmul.f32 %v826_v17, %v826_v17  ;;  %v414_v39 = vadd.f32 %v413_v18, %v1509_v46  ;;  %v527_v41 = vadd.f32 %v526_v19, %v1511_v47 }
  0xf3   : > { %v1073_v42 = vadd.f32 %v973_v27, %v969_v26  ;;  %v416_v43 = vadd.f32 %v415_v23, %v1513_v48  ;;  %v529_v44 = vadd.f32 %v528_v24, %v1515_v49  ;;  %v418_v45 = vadd.f32 %v417_v29, %v1509_v46 }
  0xf4   : > { %v1052_v50 = vadd.f32 %v972_v33, %v968_v28  ;;  %v531_v51 = vadd.f32 %v530_v30, %v1511_v47  ;;  %v420_v52 = vadd.f32 %v419_v35, %v1513_v48  ;;  %v533_v53 = vadd.f32 %v532_v36, %v1515_v49 }
  0xf5   : > { %v1094_v54 = vadd.f32 %v974_v38, %v970_v34  ;;  %v1308_v55 = vpack.c.bf16 %v416_v43, %v414_v39  ;;  %v1309_v56 = vpack.c.bf16 %v529_v44, %v527_v41  ;;  %v599_v57 = vpack.c.bf16 %v418_v45, %v414_v39 }
  0xf6   : > { %v601_v58 = vpack.c.bf16 %v531_v51, %v527_v41  ;;  %v600_v59 = vpack.c.bf16 %v420_v52, %v416_v43  ;;  %v1310_v60 = vpack.c.bf16 %v420_v52, %v418_v45  ;;  %v602_v61 = vpack.c.bf16 %v533_v53, %v529_v44  ;;  %v423_v62 = vpop.f32.mrb[8].mxu0  ;;  %v536_v63 = vpop.f32.mrb[8].mxu1 }
  0xf7   : > { %791 = vst [vmem:[%s1525_s28 + $0x20] sm:$0xff] %v1308_v55  ;;  %792 = vst [vmem:[%s1525_s28 + $0x28] sm:$0xff] %v1309_v56  ;;  %v827_v0 = vunpack.c.l.bf16 %v599_v57  ;;  %v831_v1 = vunpack.c.h.bf16 %v599_v57  ;;  %v1311_v2 = vpack.c.bf16 %v533_v53, %v531_v51  ;;  %v424_v3 = vadd.f32 %v423_v62, %v1509_v46  ;;  %v425_v4 = vpop.f32.mrb[9].mxu0  ;;  %v538_v5 = vpop.f32.mrb[9].mxu1 }
  0xf8   : > { %v829_v6 = vunpack.c.l.bf16 %v601_v58  ;;  %v833_v7 = vunpack.c.h.bf16 %v601_v58  ;;  %793 = vst [vmem:[%s1525_s28 + $0x30] sm:$0xff] %v1310_v60  ;;  %v828_v8 = vunpack.c.l.bf16 %v600_v59  ;;  %v832_v9 = vunpack.c.h.bf16 %v600_v59  ;;  %v427_v10 = vpop.f32.mrb[10].mxu0  ;;  %v540_v11 = vpop.f32.mrb[10].mxu1 }
  0xf9   : > { %v884_v12 = vadd.f32 %v883_v20, %v827_v0  ;;  %v975_v13 = vmul.f32 %v827_v0, %v827_v0  ;;  %v979_v14 = vmul.f32 %v831_v1, %v831_v1  ;;  %794 = vst [vmem:[%s1525_s28 + $0x38] sm:$0xff] %v1311_v2  ;;  %v830_v15 = vunpack.c.l.bf16 %v602_v61  ;;  %v429_v16 = vpop.f32.mrb[11].mxu0  ;;  %v542_v17 = vpop.f32.mrb[11].mxu1 }
  0xfa   : > { %v926_v18 = vadd.f32 %v925_v25, %v829_v6  ;;  %v977_v19 = vmul.f32 %v829_v6, %v829_v6  ;;  %v981_v21 = vmul.f32 %v833_v7, %v833_v7  ;;  %v905_v22 = vadd.f32 %v904_v32, %v828_v8 }
  0xfb   : > { %v885_v23 = vadd.f32 %v884_v12, %v831_v1  ;;  %v1032_v24 = vadd.f32 %v1031_v31, %v975_v13  ;;  %v976_v26 = vmul.f32 %v828_v8, %v828_v8  ;;  %v980_v27 = vmul.f32 %v832_v9, %v832_v9 }
  0xfc   : > { %v927_v28 = vadd.f32 %v926_v18, %v833_v7  ;;  %v1074_v29 = vadd.f32 %v1073_v42, %v977_v19  ;;  %v906_v30 = vadd.f32 %v905_v22, %v832_v9  ;;  %v834_v33 = vunpack.c.h.bf16 %v602_v61 }
  0xfd   : > { %v1033_v34 = vadd.f32 %v1032_v24, %v979_v14  ;;  %v1053_v20 = vadd.f32 %v1052_v50, %v976_v26  ;;  %v947_v35 = vadd.f32 %v946_v37, %v830_v15  ;;  %v978_v36 = vmul.f32 %v830_v15, %v830_v15 }
  0xfe   : > { %v1075_v38 = vadd.f32 %v1074_v29, %v981_v21  ;;  %v982_v39 = vmul.f32 %v834_v33, %v834_v33  ;;  %v537_v41 = vadd.f32 %v536_v63, %v1511_v47  ;;  %v426_v25 = vadd.f32 %v425_v4, %v1513_v48  ;;  %v433_v43 = vpop.f32.mrb[12].mxu0  ;;  %v546_v32 = vpop.f32.mrb[12].mxu1 }
  0xff   : > { %v1054_v44 = vadd.f32 %v1053_v20, %v980_v27  ;;  %v948_v31 = vadd.f32 %v947_v35, %v834_v33  ;;  %v1095_v45 = vadd.f32 %v1094_v54, %v978_v36  ;;  %v539_v42 = vadd.f32 %v538_v5, %v1515_v49  ;;  %v435_v51 = vpop.f32.mrb[13].mxu0  ;;  %v1551_v52 = vpop.f32.mrb[13].mxu1 }
 0x100   : > { %v1312_v50 = vpack.c.bf16 %v426_v25, %v424_v3  ;;  %v428_v37 = vadd.f32 %v427_v10, %v1509_v46  ;;  %v541_v53 = vadd.f32 %v540_v11, %v1511_v47  ;;  %v430_v55 = vadd.f32 %v429_v16, %v1513_v48  ;;  %v437_v56 = vpop.f32.mrb[14].mxu0  ;;  %v550_v57 = vpop.f32.mrb[14].mxu1 }
 0x101   : > { %v1096_v58 = vadd.f32 %v1095_v45, %v982_v39  ;;  %v1313_v59 = vpack.c.bf16 %v539_v42, %v537_v41  ;;  %v543_v54 = vadd.f32 %v542_v17, %v1515_v49  ;;  %v1558_v60 = vadd.f32 %v433_v43, %v1509_v46  ;;  %v439_v61 = vpop.f32.mrb[15].mxu0  ;;  %v552_v62 = vpop.f32.mrb[15].mxu1 }
 0x102   : > { %795 = vst [vmem:[%s1525_s28 + $0x40] sm:$0xff] %v1312_v50  ;;  %v603_v63 = vpack.c.bf16 %v428_v37, %v424_v3  ;;  %v605_v0 = vpack.c.bf16 %v541_v53, %v537_v41  ;;  %v604_v1 = vpack.c.bf16 %v430_v55, %v426_v25  ;;  %v1314_v2 = vpack.c.bf16 %v430_v55, %v428_v37 }
 0x103   : > { %796 = vst [vmem:[%s1525_s28 + $0x48] sm:$0xff] %v1313_v59  ;;  %v606_v4 = vpack.c.bf16 %v543_v54, %v539_v42  ;;  %v1315_v5 = vpack.c.bf16 %v543_v54, %v541_v53  ;;  %v547_v6 = vadd.f32 %v546_v32, %v1511_v47  ;;  %v436_v7 = vadd.f32 %v435_v51, %v1513_v48 }
 0x104   : > { %v835_v8 = vunpack.c.l.bf16 %v603_v63  ;;  %v839_v9 = vunpack.c.h.bf16 %v603_v63  ;;  %v837_v10 = vunpack.c.l.bf16 %v605_v0  ;;  %v841_v11 = vunpack.c.h.bf16 %v605_v0  ;;  %797 = vst [vmem:[%s1525_s28 + $0x50] sm:$0xff] %v1314_v2 }
 0x105   : > { %v836_v12 = vunpack.c.l.bf16 %v604_v1  ;;  %v840_v13 = vunpack.c.h.bf16 %v604_v1  ;;  %798 = vst [vmem:[%s1525_s28 + $0x58] sm:$0xff] %v1315_v5  ;;  %v838_v3 = vunpack.c.l.bf16 %v606_v4  ;;  %v842_v14 = vunpack.c.h.bf16 %v606_v4 }
 0x106   : > { %v886_v15 = vadd.f32 %v885_v23, %v835_v8  ;;  %v983_v16 = vmul.f32 %v835_v8, %v835_v8  ;;  %v987_v17 = vmul.f32 %v839_v9, %v839_v9  ;;  %v928_v18 = vadd.f32 %v927_v28, %v837_v10  ;;  %v443_v19 = vpop.f32.mrb[16].mxu0  ;;  %v556_v21 = vpop.f32.mrb[16].mxu1 }
 0x107   : > { %v985_v22 = vmul.f32 %v837_v10, %v837_v10  ;;  %v989_v24 = vmul.f32 %v841_v11, %v841_v11  ;;  %v907_v26 = vadd.f32 %v906_v30, %v836_v12  ;;  %v984_v27 = vmul.f32 %v836_v12, %v836_v12  ;;  %v445_v29 = vpop.f32.mrb[17].mxu0  ;;  %v1566_v33 = vpop.f32.mrb[17].mxu1 }
 0x108   : > { %v887_v20 = vadd.f32 %v886_v15, %v839_v9  ;;  %v1034_v35 = vadd.f32 %v1033_v34, %v983_v16  ;;  %v929_v36 = vadd.f32 %v928_v18, %v841_v11  ;;  %v988_v39 = vmul.f32 %v840_v13, %v840_v13  ;;  %v1568_v41 = vpop.f32.mrb[18].mxu0  ;;  %v1570_v25 = vpop.f32.mrb[18].mxu1 }
 0x109   : > { %v1076_v23 = vadd.f32 %v1075_v38, %v985_v22  ;;  %v908_v28 = vadd.f32 %v907_v26, %v840_v13  ;;  %v1055_v43 = vadd.f32 %v1054_v44, %v984_v27  ;;  %v949_v32 = vadd.f32 %v948_v31, %v838_v3  ;;  %v1572_v45 = vpop.f32.mrb[19].mxu0  ;;  %v1574_v30 = vpop.f32.mrb[19].mxu1 }
 0x10a   : > { %v1035_v42 = vadd.f32 %v1034_v35, %v987_v17  ;;  %v986_v51 = vmul.f32 %v838_v3, %v838_v3  ;;  %v990_v50 = vmul.f32 %v842_v14, %v842_v14  ;;  %v1316_v34 = vpack.c.bf16 %v436_v7, %v1558_v60 }
 0x10b   : > { %v1077_v37 = vadd.f32 %v1076_v23, %v989_v24  ;;  %v1056_v53 = vadd.f32 %v1055_v43, %v988_v39  ;;  %v950_v55 = vadd.f32 %v949_v32, %v842_v14  ;;  %v549_v59 = vadd.f32 %v1551_v52, %v1515_v49 }
 0x10c   : > { %v1097_v38 = vadd.f32 %v1096_v58, %v986_v51  ;;  %799 = vst [vmem:[%s1525_s28 + $0x60] sm:$0xff] %v1316_v34  ;;  %v438_v44 = vadd.f32 %v437_v56, %v1509_v46  ;;  %v551_v31 = vadd.f32 %v550_v57, %v1511_v47  ;;  %v440_v54 = vadd.f32 %v439_v61, %v1513_v48 }
 0x10d   : > { %v1317_v63 = vpack.c.bf16 %v549_v59, %v547_v6  ;;  %v553_v0 = vadd.f32 %v552_v62, %v1515_v49  ;;  %v1585_v1 = vadd.f32 %v443_v19, %v1509_v46  ;;  %v1588_v2 = vadd.f32 %v556_v21, %v1511_v47 }
 0x10e   : > { %v1098_v4 = vadd.f32 %v1097_v38, %v990_v50  ;;  %v607_v52 = vpack.c.bf16 %v438_v44, %v1558_v60  ;;  %v609_v58 = vpack.c.bf16 %v551_v31, %v547_v6  ;;  %v608_v5 = vpack.c.bf16 %v440_v54, %v436_v7  ;;  %v453_v56 = vpop.f32.mrb[20].mxu0  ;;  %v566_v8 = vpop.f32.mrb[20].mxu1 }
 0x10f   : > { %800 = vst [vmem:[%s1525_s28 + $0x68] sm:$0xff] %v1317_v63  ;;  %v1318_v57 = vpack.c.bf16 %v440_v54, %v438_v44  ;;  %v610_v61 = vpack.c.bf16 %v553_v0, %v549_v59  ;;  %v1319_v9 = vpack.c.bf16 %v553_v0, %v551_v31  ;;  %v446_v62 = vadd.f32 %v445_v29, %v1513_v48  ;;  %v1593_v10 = vpop.f32.mrb[21].mxu0  ;;  %v1595_v11 = vpop.f32.mrb[21].mxu1 }
 0x110   : > { %v843_v12 = vunpack.c.l.bf16 %v607_v52  ;;  %v847_v13 = vunpack.c.h.bf16 %v607_v52  ;;  %v845_v3 = vunpack.c.l.bf16 %v609_v58  ;;  %v849_v60 = vunpack.c.h.bf16 %v609_v58  ;;  %v1597_v6 = vpop.f32.mrb[22].mxu0  ;;  %v1599_v7 = vpop.f32.mrb[22].mxu1 }
 0x111   : > { %801 = vst [vmem:[%s1525_s28 + $0x70] sm:$0xff] %v1318_v57  ;;  %v844_v14 = vunpack.c.l.bf16 %v608_v5  ;;  %v848_v15 = vunpack.c.h.bf16 %v608_v5  ;;  %802 = vst [vmem:[%s1525_s28 + $0x78] sm:$0xff] %v1319_v9  ;;  %v846_v16 = vunpack.c.l.bf16 %v610_v61  ;;  %v850_v17 = vunpack.c.h.bf16 %v610_v61  ;;  %v1603_v18 = vpop.f32.mrb[23].mxu0  ;;  %v1605_v19 = vpop.f32.mrb[23].mxu1 }
 0x112   : > { %v888_v21 = vadd.f32 %v887_v20, %v843_v12  ;;  %v991_v22 = vmul.f32 %v843_v12, %v843_v12  ;;  %v995_v24 = vmul.f32 %v847_v13, %v847_v13  ;;  %v930_v26 = vadd.f32 %v929_v36, %v845_v3 }
 0x113   : > { %v993_v27 = vmul.f32 %v845_v3, %v845_v3  ;;  %v997_v29 = vmul.f32 %v849_v60, %v849_v60  ;;  %v909_v35 = vadd.f32 %v908_v28, %v844_v14  ;;  %v992_v39 = vmul.f32 %v844_v14, %v844_v14 }
 0x114   : > { %v889_v23 = vadd.f32 %v888_v21, %v847_v13  ;;  %v1036_v43 = vadd.f32 %v1035_v42, %v991_v22  ;;  %v931_v32 = vadd.f32 %v930_v26, %v849_v60  ;;  %v996_v51 = vmul.f32 %v848_v15, %v848_v15 }
 0x115   : > { %v1078_v50 = vadd.f32 %v1077_v37, %v993_v27  ;;  %v910_v34 = vadd.f32 %v909_v35, %v848_v15  ;;  %v1057_v59 = vadd.f32 %v1056_v53, %v992_v39  ;;  %v951_v38 = vadd.f32 %v950_v55, %v846_v16 }
 0x116   : > { %v1037_v44 = vadd.f32 %v1036_v43, %v995_v24  ;;  %v994_v31 = vmul.f32 %v846_v16, %v846_v16  ;;  %v998_v54 = vmul.f32 %v850_v17, %v850_v17  ;;  %v1320_v20 = vpack.c.bf16 %v446_v62, %v1585_v1  ;;  %v1608_v63 = vpop.f32.mrb[24].mxu0  ;;  %v1610_v36 = vpop.f32.mrb[24].mxu1 }
 0x117   : > { %v1079_v28 = vadd.f32 %v1078_v50, %v997_v29  ;;  %v1058_v0 = vadd.f32 %v1057_v59, %v996_v51  ;;  %v952_v52 = vadd.f32 %v951_v38, %v850_v17  ;;  %v559_v42 = vadd.f32 %v1566_v33, %v1515_v49  ;;  %v1614_v37 = vpop.f32.mrb[25].mxu0  ;;  %v1616_v58 = vpop.f32.mrb[25].mxu1 }
 0x118   : > { %v1099_v53 = vadd.f32 %v1098_v4, %v994_v31  ;;  %803 = vst [vmem:[%s1525_s28 + $0x80] sm:$0xff] %v1320_v20  ;;  %v448_v55 = vadd.f32 %v1568_v41, %v1509_v46  ;;  %v561_v5 = vadd.f32 %v1570_v25, %v1511_v47  ;;  %v450_v57 = vadd.f32 %v1572_v45, %v1513_v48  ;;  %v1625_v61 = vpop.f32.mrb[26].mxu0  ;;  %v1627_v9 = vpop.f32.mrb[26].mxu1 }
 0x119   : > { %v1321_v33 = vpack.c.bf16 %v559_v42, %v1588_v2  ;;  %v563_v4 = vadd.f32 %v1574_v30, %v1515_v49  ;;  %v1633_v12 = vadd.f32 %v453_v56, %v1509_v46  ;;  %v1636_v41 = vadd.f32 %v566_v8, %v1511_v47  ;;  %v1638_v25 = vpop.f32.mrb[27].mxu0  ;;  %v1640_v13 = vpop.f32.mrb[27].mxu1 }
 0x11a   : > { %v1100_v45 = vadd.f32 %v1099_v53, %v998_v54  ;;  %v611_v3 = vpack.c.bf16 %v448_v55, %v1585_v1  ;;  %v613_v60 = vpack.c.bf16 %v561_v5, %v1588_v2  ;;  %v612_v14 = vpack.c.bf16 %v450_v57, %v446_v62 }
 0x11b   : > { %804 = vst [vmem:[%s1525_s28 + $0x88] sm:$0xff] %v1321_v33  ;;  %v1322_v30 = vpack.c.bf16 %v450_v57, %v448_v55  ;;  %v614_v15 = vpack.c.bf16 %v563_v4, %v559_v42  ;;  %v1323_v56 = vpack.c.bf16 %v563_v4, %v561_v5  ;;  %v456_v8 = vadd.f32 %v1593_v10, %v1513_v48 }
 0x11c   : > { %v851_v16 = vunpack.c.l.bf16 %v611_v3  ;;  %v855_v17 = vunpack.c.h.bf16 %v611_v3  ;;  %v853_v21 = vunpack.c.l.bf16 %v613_v60  ;;  %v857_v22 = vunpack.c.h.bf16 %v613_v60 }
 0x11d   : > { %805 = vst [vmem:[%s1525_s28 + $0x90] sm:$0xff] %v1322_v30  ;;  %v852_v24 = vunpack.c.l.bf16 %v612_v14  ;;  %v856_v26 = vunpack.c.h.bf16 %v612_v14  ;;  %806 = vst [vmem:[%s1525_s28 + $0x98] sm:$0xff] %v1323_v56  ;;  %v854_v27 = vunpack.c.l.bf16 %v614_v15  ;;  %v858_v1 = vunpack.c.h.bf16 %v614_v15 }
 0x11e   : > { %v890_v29 = vadd.f32 %v889_v23, %v851_v16  ;;  %v999_v2 = vmul.f32 %v851_v16, %v851_v16  ;;  %v1003_v62 = vmul.f32 %v855_v17, %v855_v17  ;;  %v932_v35 = vadd.f32 %v931_v32, %v853_v21  ;;  %v1649_v39 = vpop.f32.mrb[28].mxu0  ;;  %v1651_v43 = vpop.f32.mrb[28].mxu1 }
 0x11f   : > { %v1001_v51 = vmul.f32 %v853_v21, %v853_v21  ;;  %v1005_v10 = vmul.f32 %v857_v22, %v857_v22  ;;  %v911_v50 = vadd.f32 %v910_v34, %v852_v24  ;;  %v1000_v59 = vmul.f32 %v852_v24, %v852_v24  ;;  %v1653_v38 = vpop.f32.mrb[29].mxu0  ;;  %v1655_v31 = vpop.f32.mrb[29].mxu1 }
 0x120   : > { %v891_v54 = vadd.f32 %v890_v29, %v855_v17  ;;  %v1038_v20 = vadd.f32 %v1037_v44, %v999_v2  ;;  %v933_v42 = vadd.f32 %v932_v35, %v857_v22  ;;  %v1004_v53 = vmul.f32 %v856_v26, %v856_v26  ;;  %v1657_v23 = vpop.f32.mrb[30].mxu0  ;;  %v1659_v55 = vpop.f32.mrb[30].mxu1 }
 0x121   : > { %v1080_v32 = vadd.f32 %v1079_v28, %v1001_v51  ;;  %v912_v5 = vadd.f32 %v911_v50, %v856_v26  ;;  %v1059_v57 = vadd.f32 %v1058_v0, %v1000_v59  ;;  %v953_v33 = vadd.f32 %v952_v52, %v854_v27  ;;  %v1661_v4 = vpop.f32.mrb[31].mxu0  ;;  %v1663_v34 = vpop.f32.mrb[31].mxu1 }
 0x122   : > { %v1039_v3 = vadd.f32 %v1038_v20, %v1003_v62  ;;  %v1002_v60 = vmul.f32 %v854_v27, %v854_v27  ;;  %v1006_v14 = vmul.f32 %v858_v1, %v858_v1  ;;  %v1324_v44 = vpack.c.bf16 %v456_v8, %v1633_v12 }
 0x123   : > { %v1081_v30 = vadd.f32 %v1080_v32, %v1005_v10  ;;  %v1060_v15 = vadd.f32 %v1059_v57, %v1004_v53  ;;  %v954_v56 = vadd.f32 %v953_v33, %v858_v1  ;;  %v569_v16 = vadd.f32 %v1595_v11, %v1515_v49 }
 0x124   : > { %v1101_v28 = vadd.f32 %v1100_v45, %v1002_v60  ;;  %807 = vst [vmem:[%s1525_s28 + $0xa0] sm:$0xff] %v1324_v44  ;;  %v458_v0 = vadd.f32 %v1597_v6, %v1509_v46  ;;  %v571_v52 = vadd.f32 %v1599_v7, %v1511_v47  ;;  %v460_v17 = vadd.f32 %v1603_v18, %v1513_v48 }
 0x125   : > { %v1325_v21 = vpack.c.bf16 %v569_v16, %v1636_v41  ;;  %v573_v22 = vadd.f32 %v1605_v19, %v1515_v49  ;;  %v464_v11 = vadd.f32 %v1608_v63, %v1509_v46  ;;  %v577_v45 = vadd.f32 %v1610_v36, %v1511_v47 }
 0x126   : > { %v1102_v24 = vadd.f32 %v1101_v28, %v1006_v14  ;;  %v615_v6 = vpack.c.bf16 %v458_v0, %v1633_v12  ;;  %v617_v7 = vpack.c.bf16 %v571_v52, %v1636_v41  ;;  %v616_v26 = vpack.c.bf16 %v460_v17, %v456_v8 }
 0x127   : > { %808 = vst [vmem:[%s1525_s28 + $0xa8] sm:$0xff] %v1325_v21  ;;  %v1326_v18 = vpack.c.bf16 %v460_v17, %v458_v0  ;;  %v618_v27 = vpack.c.bf16 %v573_v22, %v569_v16  ;;  %v1327_v1 = vpack.c.bf16 %v573_v22, %v571_v52  ;;  %v466_v19 = vadd.f32 %v1614_v37, %v1513_v48 }
 0x128   : > { %v859_v29 = vunpack.c.l.bf16 %v615_v6  ;;  %v863_v2 = vunpack.c.h.bf16 %v615_v6  ;;  %v861_v63 = vunpack.c.l.bf16 %v617_v7  ;;  %v865_v62 = vunpack.c.h.bf16 %v617_v7 }
 0x129   : > { %809 = vst [vmem:[%s1525_s28 + $0xb0] sm:$0xff] %v1326_v18  ;;  %v860_v36 = vunpack.c.l.bf16 %v616_v26  ;;  %v864_v35 = vunpack.c.h.bf16 %v616_v26  ;;  %810 = vst [vmem:[%s1525_s28 + $0xb8] sm:$0xff] %v1327_v1  ;;  %v862_v51 = vunpack.c.l.bf16 %v618_v27  ;;  %v866_v12 = vunpack.c.h.bf16 %v618_v27 }
 0x12a   : > { %v892_v10 = vadd.f32 %v891_v54, %v859_v29  ;;  %v1007_v41 = vmul.f32 %v859_v29, %v859_v29  ;;  %v1011_v8 = vmul.f32 %v863_v2, %v863_v2  ;;  %v934_v50 = vadd.f32 %v933_v42, %v861_v63 }
 0x12b   : > { %v1009_v59 = vmul.f32 %v861_v63, %v861_v63  ;;  %v1013_v20 = vmul.f32 %v865_v62, %v865_v62  ;;  %v913_v53 = vadd.f32 %v912_v5, %v860_v36  ;;  %v1008_v32 = vmul.f32 %v860_v36, %v860_v36 }
 0x12c   : > { %v893_v57 = vadd.f32 %v892_v10, %v863_v2  ;;  %v1040_v37 = vadd.f32 %v1039_v3, %v1007_v41  ;;  %v935_v33 = vadd.f32 %v934_v50, %v865_v62  ;;  %v1012_v60 = vmul.f32 %v864_v35, %v864_v35 }
 0x12d   : > { %v1082_v14 = vadd.f32 %v1081_v30, %v1009_v59  ;;  %v914_v44 = vadd.f32 %v913_v53, %v864_v35  ;;  %v1061_v16 = vadd.f32 %v1060_v15, %v1008_v32  ;;  %v955_v28 = vadd.f32 %v954_v56, %v862_v51 }
 0x12e   : > { %v1041_v0 = vadd.f32 %v1040_v37, %v1011_v8  ;;  %v1010_v52 = vmul.f32 %v862_v51, %v862_v51  ;;  %v1014_v17 = vmul.f32 %v866_v12, %v866_v12  ;;  %v1328_v54 = vpack.c.bf16 %v466_v19, %v464_v11 }
 0x12f   : > { %v1083_v21 = vadd.f32 %v1082_v14, %v1013_v20  ;;  %v1062_v22 = vadd.f32 %v1061_v16, %v1012_v60  ;;  %v956_v42 = vadd.f32 %v955_v28, %v866_v12  ;;  %v579_v5 = vadd.f32 %v1616_v58, %v1515_v49 }
 0x130   : > { %v1103_v6 = vadd.f32 %v1102_v24, %v1010_v52  ;;  %811 = vst [vmem:[%s1525_s28 + $0xc0] sm:$0xff] %v1328_v54  ;;  %v468_v3 = vadd.f32 %v1625_v61, %v1509_v46  ;;  %v581_v30 = vadd.f32 %v1627_v9, %v1511_v47  ;;  %v470_v15 = vadd.f32 %v1638_v25, %v1513_v48 }
 0x131   : > { %v1329_v56 = vpack.c.bf16 %v579_v5, %v577_v45  ;;  %v583_v7 = vadd.f32 %v1640_v13, %v1515_v49  ;;  %v474_v26 = vadd.f32 %v1649_v39, %v1509_v46  ;;  %v587_v58 = vadd.f32 %v1651_v43, %v1511_v47 }
 0x132   : > { %v1104_v24 = vadd.f32 %v1103_v6, %v1014_v17  ;;  %v619_v61 = vpack.c.bf16 %v468_v3, %v464_v11  ;;  %v621_v18 = vpack.c.bf16 %v581_v30, %v577_v45  ;;  %v620_v27 = vpack.c.bf16 %v470_v15, %v466_v19 }
 0x133   : > { %812 = vst [vmem:[%s1525_s28 + $0xc8] sm:$0xff] %v1329_v56  ;;  %v1330_v9 = vpack.c.bf16 %v470_v15, %v468_v3  ;;  %v622_v1 = vpack.c.bf16 %v583_v7, %v579_v5  ;;  %v1331_v25 = vpack.c.bf16 %v583_v7, %v581_v30  ;;  %v476_v29 = vadd.f32 %v1653_v38, %v1513_v48 }
 0x134   : > { %v867_v13 = vunpack.c.l.bf16 %v619_v61  ;;  %v871_v2 = vunpack.c.h.bf16 %v619_v61  ;;  %v869_v63 = vunpack.c.l.bf16 %v621_v18  ;;  %v873_v62 = vunpack.c.h.bf16 %v621_v18 }
 0x135   : > { %813 = vst [vmem:[%s1525_s28 + $0xd0] sm:$0xff] %v1330_v9  ;;  %v868_v39 = vunpack.c.l.bf16 %v620_v27  ;;  %v872_v36 = vunpack.c.h.bf16 %v620_v27  ;;  %814 = vst [vmem:[%s1525_s28 + $0xd8] sm:$0xff] %v1331_v25  ;;  %v870_v43 = vunpack.c.l.bf16 %v622_v1  ;;  %v874_v35 = vunpack.c.h.bf16 %v622_v1 }
 0x136   : > { %v894_v11 = vadd.f32 %v893_v57, %v867_v13  ;;  %v1015_v45 = vmul.f32 %v867_v13, %v867_v13  ;;  %v1019_v19 = vmul.f32 %v871_v2, %v871_v2  ;;  %v936_v51 = vadd.f32 %v935_v33, %v869_v63 }
 0x137   : > { %v1017_v12 = vmul.f32 %v869_v63, %v869_v63  ;;  %v1021_v10 = vmul.f32 %v873_v62, %v873_v62  ;;  %v915_v41 = vadd.f32 %v914_v44, %v868_v39  ;;  %v1016_v8 = vmul.f32 %v868_v39, %v868_v39 }
 0x138   : > { %v895_v50 = vadd.f32 %v894_v11, %v871_v2  ;;  %v1042_v38 = vadd.f32 %v1041_v0, %v1015_v45  ;;  %v937_v59 = vadd.f32 %v936_v51, %v873_v62  ;;  %v1020_v20 = vmul.f32 %v872_v36, %v872_v36 }
 0x139   : > { %v1084_v53 = vadd.f32 %v1083_v21, %v1017_v12  ;;  %v916_v32 = vadd.f32 %v915_v41, %v872_v36  ;;  %v1063_v37 = vadd.f32 %v1062_v22, %v1016_v8  ;;  %v957_v60 = vadd.f32 %v956_v42, %v870_v43 }
 0x13a   : > { %v1043_v14 = vadd.f32 %v1042_v38, %v1019_v19  ;;  %v1018_v16 = vmul.f32 %v870_v43, %v870_v43  ;;  %v1022_v28 = vmul.f32 %v874_v35, %v874_v35  ;;  %v1332_v57 = vpack.c.bf16 %v476_v29, %v474_v26 }
 0x13b   : > { %v1085_v52 = vadd.f32 %v1084_v53, %v1021_v10  ;;  %v1064_v33 = vadd.f32 %v1063_v37, %v1020_v20  ;;  %v958_v17 = vadd.f32 %v957_v60, %v874_v35  ;;  %v589_v44 = vadd.f32 %v1655_v31, %v1515_v49 }
 0x13c   : > { %v1105_v54 = vadd.f32 %v1104_v24, %v1018_v16  ;;  %815 = vst [vmem:[%s1525_s28 + $0xe0] sm:$0xff] %v1332_v57  ;;  %v478_v0 = vadd.f32 %v1657_v23, %v1509_v46  ;;  %v591_v21 = vadd.f32 %v1659_v55, %v1511_v47  ;;  %v480_v22 = vadd.f32 %v1661_v4, %v1513_v48 }
 0x13d   : > { %v1333_v42 = vpack.c.bf16 %v589_v44, %v587_v58  ;;  %v593_v5 = vadd.f32 %v1663_v34, %v1515_v49 }
 0x13e   : > { %v1106_v6 = vadd.f32 %v1105_v54, %v1022_v28  ;;  %v623_v3 = vpack.c.bf16 %v478_v0, %v474_v26  ;;  %v625_v31 = vpack.c.bf16 %v591_v21, %v587_v58  ;;  %v624_v30 = vpack.c.bf16 %v480_v22, %v476_v29 }
 0x13f   : > { %816 = vst [vmem:[%s1525_s28 + $0xe8] sm:$0xff] %v1333_v42  ;;  %v1334_v15 = vpack.c.bf16 %v480_v22, %v478_v0  ;;  %v626_v56 = vpack.c.bf16 %v593_v5, %v589_v44  ;;  %v1335_v46 = vpack.c.bf16 %v593_v5, %v591_v21 }
 0x140   : > { %v875_v23 = vunpack.c.l.bf16 %v623_v3  ;;  %v879_v7 = vunpack.c.h.bf16 %v623_v3  ;;  %v877_v47 = vunpack.c.l.bf16 %v625_v31  ;;  %v881_v55 = vunpack.c.h.bf16 %v625_v31 }
 0x141   : > { %817 = vst [vmem:[%s1525_s28 + $0xf0] sm:$0xff] %v1334_v15  ;;  %v876_v24 = vunpack.c.l.bf16 %v624_v30  ;;  %v880_v48 = vunpack.c.h.bf16 %v624_v30  ;;  %818 = vst [vmem:[%s1525_s28 + $0xf8] sm:$0xff] %v1335_v46  ;;  %v878_v4 = vunpack.c.l.bf16 %v626_v56  ;;  %v882_v61 = vunpack.c.h.bf16 %v626_v56 }
 0x142   : > { %v896_v49 = vadd.f32 %v895_v50, %v875_v23  ;;  %v1023_v34 = vmul.f32 %v875_v23, %v875_v23  ;;  %v1027_v18 = vmul.f32 %v879_v7, %v879_v7  ;;  %v938_v26 = vadd.f32 %v937_v59, %v877_v47 }
 0x143   : > { %v1025_v58 = vmul.f32 %v877_v47, %v877_v47  ;;  %v1029_v27 = vmul.f32 %v881_v55, %v881_v55  ;;  %v917_v9 = vadd.f32 %v916_v32, %v876_v24  ;;  %v1024_v1 = vmul.f32 %v876_v24, %v876_v24 }
 0x144   : > { %v897_v25 = vadd.f32 %v896_v49, %v879_v7  ;;  %v1044_v29 = vadd.f32 %v1043_v14, %v1023_v34  ;;  %v939_v13 = vadd.f32 %v938_v26, %v881_v55  ;;  %v1028_v2 = vmul.f32 %v880_v48, %v880_v48 }
 0x145   : > { %v1086_v63 = vadd.f32 %v1085_v52, %v1025_v58  ;;  %v918_v62 = vadd.f32 %v917_v9, %v880_v48  ;;  %v1065_v39 = vadd.f32 %v1064_v33, %v1024_v1  ;;  %v959_v36 = vadd.f32 %v958_v17, %v878_v4 }
 0x146   : > { %v898_v43 = vrot.slane %v897_v25, 4  ;;  %v1045_v35 = vadd.f32 %v1044_v29, %v1027_v18  ;;  %v940_v11 = vrot.slane %v939_v13, 4  ;;  %v1026_v45 = vmul.f32 %v878_v4, %v878_v4 }
 0x147   : > { %v1087_v19 = vadd.f32 %v1086_v63, %v1029_v27  ;;  %v919_v51 = vrot.slane %v918_v62, 4  ;;  %v1066_v12 = vadd.f32 %v1065_v39, %v1028_v2  ;;  %v960_v10 = vadd.f32 %v959_v36, %v882_v61 }
 0x148   : > { %v899_v41 = vadd.f32 %v898_v43, %v897_v25  ;;  %v1046_v8 = vrot.slane %v1045_v35, 4  ;;  %v941_v50 = vadd.f32 %v940_v11, %v939_v13  ;;  %v1030_v38 = vmul.f32 %v882_v61, %v882_v61 }
 0x149   : > { %v1088_v59 = vrot.slane %v1087_v19, 4  ;;  %v920_v20 = vadd.f32 %v919_v51, %v918_v62  ;;  %v1067_v53 = vrot.slane %v1066_v12, 4  ;;  %v961_v32 = vrot.slane %v960_v10, 4 }
 0x14a   : > { %v900_v37 = vrot.slane %v899_v41, 2  ;;  %v1047_v60 = vadd.f32 %v1046_v8, %v1045_v35  ;;  %v942_v14 = vrot.slane %v941_v50, 2  ;;  %v1107_v16 = vadd.f32 %v1106_v6, %v1026_v45 }
 0x14b   : > { %v1089_v28 = vadd.f32 %v1088_v59, %v1087_v19  ;;  %v921_v57 = vrot.slane %v920_v20, 2  ;;  %v1068_v52 = vadd.f32 %v1067_v53, %v1066_v12  ;;  %v962_v33 = vadd.f32 %v961_v32, %v960_v10 }
 0x14c   : > { %v901_v17 = vadd.f32 %v900_v37, %v899_v41  ;;  %v1048_v44 = vrot.slane %v1047_v60, 2  ;;  %v943_v54 = vadd.f32 %v942_v14, %v941_v50  ;;  %v1108_v0 = vadd.f32 %v1107_v16, %v1030_v38 }
 0x14d   : > { %v1090_v21 = vrot.slane %v1089_v28, 2  ;;  %v922_v22 = vadd.f32 %v921_v57, %v920_v20  ;;  %v1069_v42 = vrot.slane %v1068_v52, 2  ;;  %v963_v5 = vrot.slane %v962_v33, 2 }
 0x14e   : > { %v902_v3 = vrot.slane %v901_v17, 1  ;;  %v1049_v31 = vadd.f32 %v1048_v44, %v1047_v60  ;;  %v944_v30 = vrot.slane %v943_v54, 1  ;;  %v1109_v15 = vrot.slane %v1108_v0, 4 }
 0x14f   : > { %v1091_v56 = vadd.f32 %v1090_v21, %v1089_v28  ;;  %v923_v6 = vrot.slane %v922_v22, 1  ;;  %v1070_v46 = vadd.f32 %v1069_v42, %v1068_v52  ;;  %v964_v23 = vadd.f32 %v963_v5, %v962_v33 }
 0x150   : > { %v903_v7 = vadd.f32 %v902_v3, %v901_v17  ;;  %v1050_v47 = vrot.slane %v1049_v31, 1  ;;  %v945_v55 = vadd.f32 %v944_v30, %v943_v54  ;;  %v1110_v24 = vadd.f32 %v1109_v15, %v1108_v0 }
 0x151   : > { %v1092_v48 = vrot.slane %v1091_v56, 1  ;;  %v924_v4 = vadd.f32 %v923_v6, %v922_v22  ;;  %v1071_v61 = vrot.slane %v1070_v46, 1  ;;  %v965_v34 = vrot.slane %v964_v23, 1 }
 0x152   : > { %v1051_v49 = vadd.f32 %v1050_v47, %v1049_v31  ;;  %v1111_v18 = vrot.slane %v1110_v24, 2  ;;  %v1118_v27 = vsel %vm1117_vm2, %v903_v7, 0.0  ;;  %v1120_v1 = vsel %vm1117_vm2, %v945_v55, 0.0 }
 0x153   : > { %v1093_v26 = vadd.f32 %v1092_v48, %v1091_v56  ;;  %v1072_v58 = vadd.f32 %v1071_v61, %v1070_v46  ;;  %v1119_v2 = vsel %vm1117_vm2, %v924_v4, 0.0  ;;  %v966_v36 = vadd.f32 %v965_v34, %v964_v23 }
 0x154   : > { %v1123_v9 = vsel %vm1122_vm3, %v1051_v49, 0.0  ;;  %v1112_v25 = vadd.f32 %v1111_v18, %v1110_v24 }
 0x155   : > { %v1127_v29 = vadd.f32 %v1123_v9, %v1118_v27  ;;  %v1125_v13 = vsel %vm1122_vm3, %v1093_v26, 0.0  ;;  %v1124_v63 = vsel %vm1122_vm3, %v1072_v58, 0.0  ;;  %v1121_v11 = vsel %vm1117_vm2, %v966_v36, 0.0 }
 0x156   : > { %v1129_v62 = vadd.f32 %v1125_v13, %v1120_v1  ;;  %v1128_v39 = vadd.f32 %v1124_v63, %v1119_v2  ;;  %v1113_v43 = vrot.slane %v1112_v25, 1 }
 0x157   : > { %1131 = vst [vmem:[%s215_s5] sm:$0xff] %v1127_v29 }
 0x158   : > { %1133 = vst [vmem:[%s215_s5 + $0x10] sm:$0xff] %v1129_v62  ;;  %1132 = vst [vmem:[%s215_s5 + $0x8] sm:$0xff] %v1128_v39  ;;  %v1114_v35 = vadd.f32 %v1113_v43, %v1112_v25 }
 0x15a   : > { %v1126_v45 = vsel %vm1122_vm3, %v1114_v35, 0.0 }
 0x15b   : > { %v1130_v19 = vadd.f32 %v1126_v45, %v1121_v11 }
 0x15d   : > { %1134 = vst [vmem:[%s215_s5 + $0x18] sm:$0xff] %v1130_v19 }
 0x15e PF: > { %s15_s15 = sadd.s32 1, %s1369_s15  }
 0x15f   : > { %p12_p5 = scmp.ge.s32.totalorder %s15_s15, 4  }
 0x161   :  { %14 = sbr.rel (!%p12_p5) target bundleno = 1 (0x1), region = 74 }

// kernel: _lambda_.4
= control target key start
LH: loop header
LB: loop body
LE: loop exit
PB: predicated region body
PF: predicated region fallthrough
CT: control target
= control target key end

     0   :  { %s1677_s21 = smov 0   ;;  %s2025_s0 = inlined_call_operand.vmem [shape: bf16[256,512], index: 0, kind: input, shape index: {}]   ;;  %s2026_s1 = inlined_call_operand.vmem [shape: f32[1,512], index: 1, kind: input, shape index: {}]   ;;  %s2027_s2 = inlined_call_operand.vmem [shape: f32[1,512], index: 2, kind: input, shape index: {}]   ;;  %s2028_s3 = inlined_call_operand.vmem [shape: bf16[512,128], index: 3, kind: input, shape index: {}]   ;;  %s2029_s4 = inlined_call_operand.vmem [shape: f32[1,128], index: 4, kind: input, shape index: {}]   ;;  %s2030_s5 = inlined_call_operand.vmem [shape: bf16[256,128], index: 5, kind: output, shape index: {0}]   ;;  %s2031_s6 = inlined_call_operand.vmem [shape: f32[16,128], index: 6, kind: output, shape index: {1}]  }
   0x1 LB: > { %s1683_s22 = sadd.s32 4294967295, %s1640_s21   ;;  %p1344_p0 = scmp.ge.s32.totalorder %s1640_s21, 1  ;;  %s1640_s21 = sphi %s1677_s21, %s17_s21  }
   0x2   : > { %p217_p1 = scmp.lt.s32.totalorder %s1640_s21, 3 }
   0x4   : > { %p218_p2 = pnand %p1344_p0, %p217_p1 }
   0x5   : > { %v1602_v0 = vld [vmem:[%s2028_s3 + $0x40] sm:$0xff] (!%p218_p2)   ;;  %v1606_v4 = vld [vmem:[%s2028_s3 + $0x48] sm:$0xff] (!%p218_p2)   ;;  %v1610_v8 = vld [vmem:[%s2028_s3 + $0x50] sm:$0xff] (!%p218_p2)   ;;  %s1345_s9 = sshll.u32 (!%p218_p2), %s1683_s22, 4  ;;  %v368_v22 = vlaneseq (!%p218_p2)  ;;  %p265_p4 = scmp.lt.s32.totalorder (!%p218_p2), %s1683_s22, 1 }
   0x6   : > { %221 = sbr.rel (%p218_p2) target bundleno = 342 (0x156), region = 40  ;;  %v1603_v1 = vld [vmem:[%s2028_s3 + $0xc0] sm:$0xff] (!%p218_p2)   ;;  %1466 = vmatprep.subr.bf16.mxu0 (!%p218_p2), %v1602_v0  ;;  %v1607_v5 = vld [vmem:[%s2028_s3 + $0xc8] sm:$0xff] (!%p218_p2)   ;;  %v1611_v9 = vld [vmem:[%s2028_s3 + $0xd0] sm:$0xff] (!%p218_p2)   ;;  %p253_p3 = scmp.lt.s32.totalorder (!%p218_p2), %s1345_s9, 31 }
   0x7   : > { %v1604_v2 = vld [vmem:[%s2028_s3] sm:$0xff] (!%p218_p2)   ;;  %1530 = vmatprep.subr.bf16.mxu1 (!%p218_p2), %v1603_v1  ;;  %v1608_v6 = vld [vmem:[%s2028_s3 + $0x8] sm:$0xff] (!%p218_p2)   ;;  %v1612_v10 = vld [vmem:[%s2028_s3 + $0x10] sm:$0xff] (!%p218_p2)   ;;  %v1768_v27 = vshrl.u32 (!%p218_p2), %v368_v22, 7 }
   0x8   : > { %v1605_v3 = vld [vmem:[%s2028_s3 + $0x80] sm:$0xff] (!%p218_p2)   ;;  %1467 = vmatpush3.bf16.msra.mxu0 (!%p218_p2), %v1604_v2  ;;  %v1609_v7 = vld [vmem:[%s2028_s3 + $0x88] sm:$0xff] (!%p218_p2)   ;;  %v1613_v11 = vld [vmem:[%s2028_s3 + $0x90] sm:$0xff] (!%p218_p2)  }
   0x9   : > { %1531 = vmatpush3.bf16.msra.mxu1 (!%p218_p2), %v1605_v3  ;;  %1468 = vmatprep.subr.bf16.mxu0 (!%p218_p2), %v1606_v4  ;;  %v1614_v12 = vld [vmem:[%s2028_s3 + $0x58] sm:$0xff] (!%p218_p2)   ;;  %v1618_v16 = vld [vmem:[%s2028_s3 + $0x60] sm:$0xff] (!%p218_p2)   ;;  %v1622_v20 = vld [vmem:[%s2028_s3 + $0x68] sm:$0xff] (!%p218_p2)   ;;  %v374_v33 = vsub.s32 (!%p218_p2), 1, %v1768_v27  ;;  %v382_v35 = vsub.s32 (!%p218_p2), 3, %v1768_v27  ;;  %v370_v39 = vsub.s32 (!%p218_p2), 0, %v1768_v27 }
   0xa   : > { %1532 = vmatprep.subr.bf16.mxu1 (!%p218_p2), %v1607_v5  ;;  %v1615_v13 = vld [vmem:[%s2028_s3 + $0xd8] sm:$0xff] (!%p218_p2)   ;;  %v1619_v17 = vld [vmem:[%s2028_s3 + $0xe0] sm:$0xff] (!%p218_p2)   ;;  %v1623_v21 = vld [vmem:[%s2028_s3 + $0xe8] sm:$0xff] (!%p218_p2)   ;;  %v378_v40 = vsub.s32 (!%p218_p2), 2, %v1768_v27  ;;  %vm1247_vm0 = vcmp.eq.s32.totalorder (!%p218_p2), %v1768_v27, 0  ;;  %vm1249_vm1 = vcmp.eq.s32.totalorder (!%p218_p2), %v1768_v27, 1 }
   0xb   : > { %v1616_v14 = vld [vmem:[%s2028_s3 + $0x18] sm:$0xff] (!%p218_p2)   ;;  %v1620_v18 = vld [vmem:[%s2028_s3 + $0x20] sm:$0xff] (!%p218_p2)   ;;  %v1624_v23 = vld [vmem:[%s2028_s3 + $0x28] sm:$0xff] (!%p218_p2)  }
   0xc   : > { %1469 = vmatpush3.bf16.msra.mxu0 (!%p218_p2), %v1608_v6  ;;  %v1617_v15 = vld [vmem:[%s2028_s3 + $0x98] sm:$0xff] (!%p218_p2)   ;;  %v1621_v19 = vld [vmem:[%s2028_s3 + $0xa0] sm:$0xff] (!%p218_p2)   ;;  %v1625_v24 = vld [vmem:[%s2028_s3 + $0xa8] sm:$0xff] (!%p218_p2)  }
   0xd   : > { %1533 = vmatpush3.bf16.msra.mxu1 %v1609_v7  ;;  %1470 = vmatprep.subr.bf16.mxu0 %v1610_v8  ;;  %s2033_s9 = smov (!%p253_p3, %s1345_s9), 31  ;;  %v1626_v25 = vld [vmem:[%s2028_s3 + $0x70] sm:$0xff]   ;;  %v1630_v30 = vld [vmem:[%s2028_s3 + $0x78] sm:$0xff]   ;;  %v366_v38 = vld [vmem:[%s2026_s1] sm:$0xf]  ;;  %s2035_s22 = smov (!%p265_p4, %s1683_s22), 1 }
   0xe   : > { %1534 = vmatprep.subr.bf16.mxu1 %v1611_v9  ;;  %v1627_v26 = vld [vmem:[%s2028_s3 + $0xf0] sm:$0xff]   ;;  %s1402_s11 = sshll.u32 %s2033_s9, 4  ;;  %v1631_v31 = vld [vmem:[%s2028_s3 + $0xf8] sm:$0xff]   ;;  %v452_v45 = vld [vmem:[%s2027_s2] sm:$0xf]  ;;  %v1808_v48 = vrot.slane %v366_v38, %v374_v33  ;;  %v1812_v54 = vrot.slane %v366_v38, %v382_v35  ;;  %v1818_v58 = vrot.slane %v366_v38, %v370_v39  ;;  %v1824_v62 = vrot.slane %v366_v38, %v378_v40  ;;  %s1349_s10 = sshll.u32 %s2033_s9, 2 }
   0xf   : > { %v1628_v28 = vld [vmem:[%s2028_s3 + $0x30] sm:$0xff]   ;;  %s1786_s20 = scalar_lea.vmem %s2025_s0, %s1402_s11  ;;  %v1632_v32 = vld [vmem:[%s2028_s3 + $0x38] sm:$0xff]   ;;  %v1810_v49 = vrot.slane %v452_v45, %v374_v33  ;;  %v1814_v55 = vrot.slane %v452_v45, %v382_v35  ;;  %v1820_v59 = vrot.slane %v452_v45, %v370_v39  ;;  %v1826_v63 = vrot.slane %v452_v45, %v378_v40  ;;  %s1991_s13 = scalar_lea.vmem %s2030_s5, %s1349_s10 }
  0x10   : > { %1471 = vmatpush3.bf16.msra.mxu0 %v1612_v10  ;;  %v1629_v29 = vld [vmem:[%s2028_s3 + $0xb0] sm:$0xff]   ;;  %v1633_v34 = vld [vmem:[%s2028_s3 + $0xb8] sm:$0xff]   ;;  %v270_v36 = vld [vmem:[%s1786_s20] sm:$0xff]  ;;  %s1350_s9 = sshll.u32 %s2035_s22, 3 }
  0x11   : > { %1535 = vmatpush3.bf16.msra.mxu1 %v1613_v11  ;;  %1472 = vmatprep.subr.bf16.mxu0 %v1614_v12  ;;  %v272_v37 = vld [vmem:[%s1786_s20 + $0x10] sm:$0xff]  ;;  %v302_v41 = vunpack.c.l.bf16 %v270_v36  ;;  %v303_v42 = vunpack.c.h.bf16 %v270_v36  ;;  %v271_v46 = vld [vmem:[%s1786_s20 + $0x8] sm:$0xff]  ;;  %v273_v47 = vld [vmem:[%s1786_s20 + $0x18] sm:$0xff]  ;;  %s268_s16 = scalar_lea.vmem %s2031_s6, %s1350_s9 }
  0x12   : > { %1536 = vmatprep.subr.bf16.mxu1 %v1615_v13  ;;  %v306_v43 = vunpack.c.l.bf16 %v272_v37  ;;  %v307_v44 = vunpack.c.h.bf16 %v272_v37  ;;  %v304_v50 = vunpack.c.l.bf16 %v271_v46  ;;  %v305_v51 = vunpack.c.h.bf16 %v271_v46  ;;  %v274_v8 = vld [vmem:[%s1786_s20 + $0x20] sm:$0xff]  ;;  %v276_v13 = vld [vmem:[%s1786_s20 + $0x30] sm:$0xff] }
  0x13   : > { %v308_v52 = vunpack.c.l.bf16 %v273_v47  ;;  %v309_v53 = vunpack.c.h.bf16 %v273_v47  ;;  %v389_v56 = vmul.f32 %v1808_v48, %v303_v42  ;;  %v388_v2 = vmul.f32 %v1818_v58, %v302_v41  ;;  %v278_v45 = vld [vmem:[%s1786_s20 + $0x40] sm:$0xff] }
  0x14   : > { %1473 = vmatpush3.bf16.msra.mxu0 %v1616_v14  ;;  %v393_v57 = vmul.f32 %v1808_v48, %v307_v44  ;;  %v391_v60 = vmul.f32 %v1812_v54, %v305_v51  ;;  %v392_v3 = vmul.f32 %v1818_v58, %v306_v43  ;;  %v390_v6 = vmul.f32 %v1824_v62, %v304_v50 }
  0x15   : > { %1537 = vmatpush3.bf16.msra.mxu1 %v1617_v15  ;;  %1474 = vmatprep.subr.bf16.mxu0 %v1618_v16  ;;  %v395_v61 = vmul.f32 %v1812_v54, %v309_v53  ;;  %v475_v0 = vadd.f32 %v1810_v49, %v389_v56  ;;  %v394_v7 = vmul.f32 %v1824_v62, %v308_v52  ;;  %v310_v35 = vunpack.c.l.bf16 %v274_v8 }
  0x16   : > { %1538 = vmatprep.subr.bf16.mxu1 %v1619_v17  ;;  %v479_v1 = vadd.f32 %v1810_v49, %v393_v57  ;;  %v477_v4 = vadd.f32 %v1814_v55, %v391_v60  ;;  %v474_v11 = vadd.f32 %v1820_v59, %v388_v2  ;;  %v478_v12 = vadd.f32 %v1820_v59, %v392_v3  ;;  %v280_v60 = vld [vmem:[%s1786_s20 + $0x50] sm:$0xff]  ;;  %v279_v3 = vld [vmem:[%s1786_s20 + $0x48] sm:$0xff] }
  0x17   : > { %v481_v5 = vadd.f32 %v1814_v55, %v395_v61  ;;  %v539_v9 = vmax.f32 %v475_v0, 0.0  ;;  %v476_v16 = vadd.f32 %v1826_v63, %v390_v6  ;;  %v480_v17 = vadd.f32 %v1826_v63, %v394_v7 }
  0x18   : > { %1475 = vmatpush3.bf16.msra.mxu0 %v1620_v18  ;;  %v543_v10 = vmax.f32 %v479_v1, 0.0  ;;  %v541_v14 = vmax.f32 %v477_v4, 0.0  ;;  %v275_v18 = vld [vmem:[%s1786_s20 + $0x28] sm:$0xff]  ;;  %v542_v22 = vmax.f32 %v478_v12, 0.0  ;;  %v314_v36 = vunpack.c.l.bf16 %v276_v13  ;;  %v281_v4 = vld [vmem:[%s1786_s20 + $0x58] sm:$0xff] }
  0x19   : > { %1539 = vmatpush3.bf16.msra.mxu1 %v1621_v19  ;;  %1476 = vmatprep.subr.bf16.mxu0 %v1622_v20  ;;  %v545_v15 = vmax.f32 %v481_v5, 0.0  ;;  %v277_v19 = vld [vmem:[%s1786_s20 + $0x38] sm:$0xff]  ;;  %v312_v40 = vunpack.c.l.bf16 %v275_v18  ;;  %v396_v42 = vmul.f32 %v1818_v58, %v310_v35  ;;  %v319_v2 = vunpack.c.h.bf16 %v278_v45  ;;  %v284_v35 = vld [vmem:[%s1786_s20 + $0x70] sm:$0xff] }
  0x1a   : > { %1540 = vmatprep.subr.bf16.mxu1 %v1623_v21  ;;  %v603_v20 = vpack.c.bf16 %v543_v10, %v539_v9  ;;  %v538_v21 = vmax.f32 %v474_v11, 0.0  ;;  %v400_v43 = vmul.f32 %v1818_v58, %v314_v36  ;;  %v316_v44 = vunpack.c.l.bf16 %v277_v19 }
  0x1b   : > { %v398_v51 = vmul.f32 %v1824_v62, %v312_v40  ;;  %v482_v53 = vadd.f32 %v1820_v59, %v396_v42  ;;  %v323_v11 = vunpack.c.h.bf16 %v280_v60  ;;  %v405_v12 = vmul.f32 %v1808_v48, %v319_v2 }
  0x1c   : > { %1477 = vmatpush3.bf16.msra.mxu0 %v1624_v23  ;;  %v311_v23 = vunpack.c.h.bf16 %v274_v8  ;;  %929 = vmatprep.mubr.bf16.mxu0 %v603_v20  ;;  %v486_v56 = vadd.f32 %v1820_v59, %v400_v43  ;;  %v402_v57 = vmul.f32 %v1824_v62, %v316_v44  ;;  %v322_v20 = vunpack.c.l.bf16 %v280_v60  ;;  %v283_v44 = vld [vmem:[%s1786_s20 + $0x68] sm:$0xff] }
  0x1d   : > { %1541 = vmatpush3.bf16.msra.mxu1 %v1625_v24  ;;  %1478 = vmatprep.subr.bf16.mxu0 %v1626_v25  ;;  %v605_v24 = vpack.c.bf16 %v545_v15, %v541_v14  ;;  %v540_v25 = vmax.f32 %v476_v16, 0.0  ;;  %v484_v1 = vadd.f32 %v1826_v63, %v398_v51  ;;  %v546_v6 = vmax.f32 %v482_v53, 0.0 }
  0x1e   : > { %1542 = vmatprep.subr.bf16.mxu1 %v1627_v26  ;;  %v544_v26 = vmax.f32 %v480_v17, 0.0  ;;  %v550_v7 = vmax.f32 %v486_v56, 0.0  ;;  %v488_v8 = vadd.f32 %v1826_v63, %v402_v57  ;;  %v321_v15 = vunpack.c.h.bf16 %v279_v3 }
  0x1f   : > { %1026 = vmatprep.mubr.bf16.mxu1 %v605_v24  ;;  %v548_v10 = vmax.f32 %v484_v1, 0.0  ;;  %v325_v16 = vunpack.c.h.bf16 %v281_v4  ;;  %v409_v17 = vmul.f32 %v1808_v48, %v323_v11  ;;  %v320_v24 = vunpack.c.l.bf16 %v279_v3 }
  0x20   : > { %1479 = vmatpush3.bf16.msra.mxu0 %v1628_v28  ;;  %v315_v28 = vunpack.c.h.bf16 %v276_v13  ;;  %v604_v33 = vpack.c.bf16 %v544_v26, %v540_v25  ;;  %v606_v13 = vpack.c.bf16 %v550_v7, %v546_v6  ;;  %v552_v14 = vmax.f32 %v488_v8, 0.0  ;;  %v282_v25 = vld [vmem:[%s1786_s20 + $0x60] sm:$0xff] }
  0x21   : > { %1543 = vmatpush3.bf16.msra.mxu1 %v1629_v29  ;;  %1480 = vmatprep.subr.bf16.mxu0 %v1630_v30  ;;  %v602_v29 = vpack.c.bf16 %v542_v22, %v538_v21  ;;  %v397_v30 = vmul.f32 %v1808_v48, %v311_v23  ;;  %v407_v22 = vmul.f32 %v1812_v54, %v321_v15  ;;  %v331_v51 = vunpack.c.h.bf16 %v284_v35 }
  0x22   : > { %1544 = vmatprep.subr.bf16.mxu1 %v1631_v31  ;;  %v313_v31 = vunpack.c.h.bf16 %v275_v18  ;;  %v491_v18 = vadd.f32 %v1810_v49, %v405_v12  ;;  %v608_v21 = vpack.c.bf16 %v552_v14, %v548_v10  ;;  %v411_v23 = vmul.f32 %v1812_v54, %v325_v16  ;;  %v286_v10 = vld [vmem:[%s1786_s20 + $0x80] sm:$0xff] }
  0x23   : > { %v483_v37 = vadd.f32 %v1810_v49, %v397_v30  ;;  %v495_v26 = vadd.f32 %v1810_v49, %v409_v17  ;;  %v408_v30 = vmul.f32 %v1818_v58, %v322_v20 }
  0x24   : > { %1481 = vmatpush3.bf16.msra.mxu0 %v1632_v32  ;;  %v317_v32 = vunpack.c.h.bf16 %v277_v19  ;;  %v399_v38 = vmul.f32 %v1812_v54, %v313_v31  ;;  %v318_v19 = vunpack.c.l.bf16 %v278_v45  ;;  %v493_v31 = vadd.f32 %v1814_v55, %v407_v22  ;;  %v285_v45 = vld [vmem:[%s1786_s20 + $0x78] sm:$0xff] }
  0x25   : > { %1545 = vmatpush3.bf16.msra.mxu1 %v1633_v34  ;;  %v401_v34 = vmul.f32 %v1808_v48, %v315_v28  ;;  %v547_v46 = vmax.f32 %v483_v37, 0.0  ;;  %v555_v28 = vmax.f32 %v491_v18, 0.0  ;;  %v559_v36 = vmax.f32 %v495_v26, 0.0 }
  0x26   : > { %v403_v39 = vmul.f32 %v1812_v54, %v317_v32  ;;  %v485_v47 = vadd.f32 %v1814_v55, %v399_v38  ;;  %v497_v32 = vadd.f32 %v1814_v55, %v411_v23  ;;  %v494_v38 = vadd.f32 %v1820_v59, %v408_v30  ;;  %v289_v30 = vld [vmem:[%s1786_s20 + $0x98] sm:$0xff] }
  0x27   : > { %930 = vmatmul.mubr.bf16.vlgmr.msra.gmra.mrb[0].mxu0 %v602_v29  ;;  %v487_v41 = vadd.f32 %v1810_v49, %v401_v34  ;;  %v404_v29 = vmul.f32 %v1818_v58, %v318_v19  ;;  %v406_v34 = vmul.f32 %v1824_v62, %v320_v24  ;;  %v557_v40 = vmax.f32 %v493_v31, 0.0  ;;  %v288_v19 = vld [vmem:[%s1786_s20 + $0x90] sm:$0xff]  ;;  %v287_v24 = vld [vmem:[%s1786_s20 + $0x88] sm:$0xff] }
  0x28   : > { %1027 = vmatmul.mubr.bf16.vlgmr.msra.gmra.mrb[0].mxu1 %v604_v33  ;;  %v489_v50 = vadd.f32 %v1814_v55, %v403_v39  ;;  %v549_v61 = vmax.f32 %v485_v47, 0.0  ;;  %v324_v33 = vunpack.c.l.bf16 %v281_v4  ;;  %v327_v39 = vunpack.c.h.bf16 %v282_v25 }
  0x29   : > { %v551_v52 = vmax.f32 %v487_v41, 0.0  ;;  %v490_v37 = vadd.f32 %v1820_v59, %v404_v29  ;;  %v561_v41 = vmax.f32 %v497_v32, 0.0  ;;  %v492_v43 = vadd.f32 %v1826_v63, %v406_v34 }
  0x2a   : > { %v553_v0 = vmax.f32 %v489_v50, 0.0  ;;  %v410_v42 = vmul.f32 %v1824_v62, %v324_v33  ;;  %v558_v50 = vmax.f32 %v494_v38, 0.0  ;;  %v413_v57 = vmul.f32 %v1808_v48, %v327_v39 }
  0x2b   : > { %v607_v5 = vpack.c.bf16 %v551_v52, %v547_v46  ;;  %v611_v46 = vpack.c.bf16 %v559_v36, %v555_v28  ;;  %v554_v47 = vmax.f32 %v490_v37, 0.0  ;;  %v613_v52 = vpack.c.bf16 %v561_v41, %v557_v40 }
  0x2c   : > { %v609_v9 = vpack.c.bf16 %v553_v0, %v549_v61  ;;  %v496_v53 = vadd.f32 %v1826_v63, %v410_v42  ;;  %v556_v56 = vmax.f32 %v492_v43, 0.0  ;;  %v417_v61 = vmul.f32 %v1808_v48, %v331_v51 }
  0x2d   : > { %937 = vmatprep.mubr.bf16.mxu0 %v607_v5  ;;  %v610_v60 = vpack.c.bf16 %v558_v50, %v554_v47  ;;  %v329_v0 = vunpack.c.h.bf16 %v283_v44  ;;  %v333_v1 = vunpack.c.h.bf16 %v285_v45  ;;  %v499_v3 = vadd.f32 %v1810_v49, %v413_v57 }
  0x2e   : > { %1034 = vmatprep.mubr.bf16.mxu1 %v609_v9  ;;  %v560_v2 = vmax.f32 %v496_v53, 0.0  ;;  %v326_v4 = vunpack.c.l.bf16 %v282_v25  ;;  %v330_v5 = vunpack.c.l.bf16 %v284_v35  ;;  %v503_v6 = vadd.f32 %v1810_v49, %v417_v61  ;;  %v290_v53 = vld [vmem:[%s1786_s20 + $0xa0] sm:$0xff] }
  0x2f   : > { %938 = vmatmul.mubr.bf16.gmra.mrb[4].mxu0 %v606_v13  ;;  %v415_v7 = vmul.f32 %v1812_v54, %v329_v0  ;;  %v419_v8 = vmul.f32 %v1812_v54, %v333_v1  ;;  %v328_v9 = vunpack.c.l.bf16 %v283_v44  ;;  %v563_v12 = vmax.f32 %v499_v3, 0.0 }
  0x30   : > { %1035 = vmatmul.mubr.bf16.gmra.mrb[4].mxu1 %v608_v21  ;;  %945 = vmatprep.mubr.bf16.mxu0 %v611_v46  ;;  %v612_v11 = vpack.c.bf16 %v560_v2, %v556_v56  ;;  %v412_v13 = vmul.f32 %v1818_v58, %v326_v4  ;;  %v416_v14 = vmul.f32 %v1818_v58, %v330_v5  ;;  %v567_v15 = vmax.f32 %v503_v6, 0.0  ;;  %v292_v4 = vld [vmem:[%s1786_s20 + $0xb0] sm:$0xff] }
  0x31   : > { %1042 = vmatprep.mubr.bf16.mxu1 %v613_v52  ;;  %v501_v16 = vadd.f32 %v1814_v55, %v415_v7  ;;  %v505_v17 = vadd.f32 %v1814_v55, %v419_v8  ;;  %v332_v18 = vunpack.c.l.bf16 %v285_v45  ;;  %v414_v22 = vmul.f32 %v1824_v62, %v328_v9  ;;  %v291_v9 = vld [vmem:[%s1786_s20 + $0xa8] sm:$0xff] }
  0x32   : > { %v498_v20 = vadd.f32 %v1820_v59, %v412_v13  ;;  %v502_v21 = vadd.f32 %v1820_v59, %v416_v14  ;;  %v335_v23 = vunpack.c.h.bf16 %v286_v10  ;;  %v615_v25 = vpack.c.bf16 %v567_v15, %v563_v12  ;;  %v293_v14 = vld [vmem:[%s1786_s20 + $0xb8] sm:$0xff] }
  0x33   : > { %v565_v26 = vmax.f32 %v501_v16, 0.0  ;;  %v569_v28 = vmax.f32 %v505_v17, 0.0  ;;  %v418_v29 = vmul.f32 %v1824_v62, %v332_v18  ;;  %v500_v33 = vadd.f32 %v1826_v63, %v414_v22 }
  0x34   : > { %v562_v31 = vmax.f32 %v498_v20, 0.0  ;;  %v566_v32 = vmax.f32 %v502_v21, 0.0  ;;  %v339_v34 = vunpack.c.h.bf16 %v288_v19  ;;  %v421_v37 = vmul.f32 %v1808_v48, %v335_v23 }
  0x35   : > { %v617_v35 = vpack.c.bf16 %v569_v28, %v565_v26  ;;  %v504_v36 = vadd.f32 %v1826_v63, %v418_v29  ;;  %v337_v38 = vunpack.c.h.bf16 %v287_v24  ;;  %v564_v40 = vmax.f32 %v500_v33, 0.0 }
  0x36   : > { %v614_v39 = vpack.c.bf16 %v566_v32, %v562_v31  ;;  %v425_v41 = vmul.f32 %v1808_v48, %v339_v34  ;;  %v341_v42 = vunpack.c.h.bf16 %v289_v30  ;;  %v507_v44 = vadd.f32 %v1810_v49, %v421_v37 }
  0x37   : > { %946 = vmatmul.mubr.bf16.gmra.mrb[8].mxu0 %v610_v60  ;;  %v568_v43 = vmax.f32 %v504_v36, 0.0  ;;  %v423_v45 = vmul.f32 %v1812_v54, %v337_v38  ;;  %v334_v46 = vunpack.c.l.bf16 %v286_v10  ;;  %v338_v51 = vunpack.c.l.bf16 %v288_v19  ;;  %v294_v36 = vld [vmem:[%s1786_s20 + $0xc0] sm:$0xff] }
  0x38   : > { %1043 = vmatmul.mubr.bf16.gmra.mrb[8].mxu1 %v612_v11  ;;  %953 = vmatprep.mubr.bf16.mxu0 %v615_v25  ;;  %v511_v47 = vadd.f32 %v1810_v49, %v425_v41  ;;  %v427_v50 = vmul.f32 %v1812_v54, %v341_v42  ;;  %v336_v52 = vunpack.c.l.bf16 %v287_v24  ;;  %v571_v57 = vmax.f32 %v507_v44, 0.0 }
  0x39   : > { %1050 = vmatprep.mubr.bf16.mxu1 %v617_v35  ;;  %v616_v56 = vpack.c.bf16 %v568_v43, %v564_v40  ;;  %v509_v60 = vadd.f32 %v1814_v55, %v423_v45  ;;  %v420_v61 = vmul.f32 %v1818_v58, %v334_v46  ;;  %v424_v2 = vmul.f32 %v1818_v58, %v338_v51  ;;  %v296_v45 = vld [vmem:[%s1786_s20 + $0xd0] sm:$0xff] }
  0x3a   : > { %v575_v0 = vmax.f32 %v511_v47, 0.0  ;;  %v513_v1 = vadd.f32 %v1814_v55, %v427_v50  ;;  %v340_v3 = vunpack.c.l.bf16 %v289_v30  ;;  %v422_v7 = vmul.f32 %v1824_v62, %v336_v52  ;;  %v295_v52 = vld [vmem:[%s1786_s20 + $0xc8] sm:$0xff] }
  0x3b   : > { %v573_v5 = vmax.f32 %v509_v60, 0.0  ;;  %v506_v6 = vadd.f32 %v1820_v59, %v420_v61  ;;  %v343_v8 = vunpack.c.h.bf16 %v290_v53  ;;  %v510_v12 = vadd.f32 %v1820_v59, %v424_v2  ;;  %v297_v61 = vld [vmem:[%s1786_s20 + $0xd8] sm:$0xff] }
  0x3c   : > { %v619_v10 = vpack.c.bf16 %v575_v0, %v571_v57  ;;  %v577_v11 = vmax.f32 %v513_v1, 0.0  ;;  %v426_v13 = vmul.f32 %v1824_v62, %v340_v3  ;;  %v508_v16 = vadd.f32 %v1826_v63, %v422_v7 }
  0x3d   : > { %v570_v15 = vmax.f32 %v506_v6, 0.0  ;;  %v347_v17 = vunpack.c.h.bf16 %v292_v4  ;;  %v429_v18 = vmul.f32 %v1808_v48, %v343_v8  ;;  %v574_v20 = vmax.f32 %v510_v12, 0.0 }
  0x3e   : > { %v621_v19 = vpack.c.bf16 %v577_v11, %v573_v5  ;;  %v512_v21 = vadd.f32 %v1826_v63, %v426_v13  ;;  %v345_v22 = vunpack.c.h.bf16 %v291_v9  ;;  %v572_v23 = vmax.f32 %v508_v16, 0.0 }
  0x3f   : > { %954 = vmatmul.mubr.bf16.gmra.mrb[12].mxu0 %v614_v39  ;;  %v433_v24 = vmul.f32 %v1808_v48, %v347_v17  ;;  %v515_v25 = vadd.f32 %v1810_v49, %v429_v18  ;;  %v349_v26 = vunpack.c.h.bf16 %v293_v14  ;;  %v618_v28 = vpack.c.bf16 %v574_v20, %v570_v15  ;;  %v298_v20 = vld [vmem:[%s1786_s20 + $0xe0] sm:$0xff] }
  0x40   : > { %1051 = vmatmul.mubr.bf16.gmra.mrb[12].mxu1 %v616_v56  ;;  %961 = vmatprep.mubr.bf16.mxu0 %v619_v10  ;;  %v576_v29 = vmax.f32 %v512_v21, 0.0  ;;  %v431_v30 = vmul.f32 %v1812_v54, %v345_v22  ;;  %v342_v31 = vunpack.c.l.bf16 %v290_v53  ;;  %v346_v35 = vunpack.c.l.bf16 %v292_v4 }
  0x41   : > { %1058 = vmatprep.mubr.bf16.mxu1 %v621_v19  ;;  %v519_v32 = vadd.f32 %v1810_v49, %v433_v24  ;;  %v579_v33 = vmax.f32 %v515_v25, 0.0  ;;  %v435_v34 = vmul.f32 %v1812_v54, %v349_v26  ;;  %v344_v40 = vunpack.c.l.bf16 %v291_v9 }
  0x42   : > { %v620_v37 = vpack.c.bf16 %v576_v29, %v572_v23  ;;  %v517_v38 = vadd.f32 %v1814_v55, %v431_v30  ;;  %v428_v39 = vmul.f32 %v1818_v58, %v342_v31  ;;  %v432_v43 = vmul.f32 %v1818_v58, %v346_v35  ;;  %v300_v30 = vld [vmem:[%s1786_s20 + $0xf0] sm:$0xff]  ;;  %v299_v35 = vld [vmem:[%s1786_s20 + $0xe8] sm:$0xff] }
  0x43   : > { %v583_v41 = vmax.f32 %v519_v32, 0.0  ;;  %v521_v42 = vadd.f32 %v1814_v55, %v435_v34  ;;  %v348_v44 = vunpack.c.l.bf16 %v293_v14  ;;  %v430_v50 = vmul.f32 %v1824_v62, %v344_v40  ;;  %v301_v40 = vld [vmem:[%s1786_s20 + $0xf8] sm:$0xff] }
  0x44   : > { %v581_v46 = vmax.f32 %v517_v38, 0.0  ;;  %v514_v47 = vadd.f32 %v1820_v59, %v428_v39  ;;  %v351_v51 = vunpack.c.h.bf16 %v294_v36  ;;  %v518_v57 = vadd.f32 %v1820_v59, %v432_v43 }
  0x45   : > { %v623_v53 = vpack.c.bf16 %v583_v41, %v579_v33  ;;  %v585_v56 = vmax.f32 %v521_v42, 0.0  ;;  %v434_v60 = vmul.f32 %v1824_v62, %v348_v44  ;;  %v516_v1 = vadd.f32 %v1826_v63, %v430_v50 }
  0x46   : > { %v578_v0 = vmax.f32 %v514_v47, 0.0  ;;  %v355_v2 = vunpack.c.h.bf16 %v296_v45  ;;  %v437_v3 = vmul.f32 %v1808_v48, %v351_v51  ;;  %v582_v5 = vmax.f32 %v518_v57, 0.0 }
  0x47   : > { %962 = vmatmul.mubr.bf16.gmra.mrb[16].mxu0 %v618_v28  ;;  %v625_v4 = vpack.c.bf16 %v585_v56, %v581_v46  ;;  %v520_v6 = vadd.f32 %v1826_v63, %v434_v60  ;;  %v353_v7 = vunpack.c.h.bf16 %v295_v52  ;;  %v580_v8 = vmax.f32 %v516_v1, 0.0 }
  0x48   : > { %1059 = vmatmul.mubr.bf16.gmra.mrb[16].mxu1 %v620_v37  ;;  %969 = vmatprep.mubr.bf16.mxu0 %v623_v53  ;;  %v441_v9 = vmul.f32 %v1808_v48, %v355_v2  ;;  %v523_v10 = vadd.f32 %v1810_v49, %v437_v3  ;;  %v357_v11 = vunpack.c.h.bf16 %v297_v61  ;;  %v622_v12 = vpack.c.bf16 %v582_v5, %v578_v0 }
  0x49   : > { %1066 = vmatprep.mubr.bf16.mxu1 %v625_v4  ;;  %v584_v13 = vmax.f32 %v520_v6, 0.0  ;;  %v439_v14 = vmul.f32 %v1812_v54, %v353_v7  ;;  %v350_v15 = vunpack.c.l.bf16 %v294_v36  ;;  %v354_v19 = vunpack.c.l.bf16 %v296_v45 }
  0x4a   : > { %v527_v16 = vadd.f32 %v1810_v49, %v441_v9  ;;  %v587_v17 = vmax.f32 %v523_v10, 0.0  ;;  %v443_v18 = vmul.f32 %v1812_v54, %v357_v11  ;;  %v352_v24 = vunpack.c.l.bf16 %v295_v52 }
  0x4b   : > { %v624_v21 = vpack.c.bf16 %v584_v13, %v580_v8  ;;  %v525_v22 = vadd.f32 %v1814_v55, %v439_v14  ;;  %v436_v23 = vmul.f32 %v1818_v58, %v350_v15  ;;  %v440_v28 = vmul.f32 %v1818_v58, %v354_v19 }
  0x4c   : > { %v591_v25 = vmax.f32 %v527_v16, 0.0  ;;  %v529_v26 = vadd.f32 %v1814_v55, %v443_v18  ;;  %v356_v29 = vunpack.c.l.bf16 %v297_v61  ;;  %v438_v33 = vmul.f32 %v1824_v62, %v352_v24 }
  0x4d   : > { %v589_v31 = vmax.f32 %v525_v22, 0.0  ;;  %v522_v32 = vadd.f32 %v1820_v59, %v436_v23  ;;  %v359_v34 = vunpack.c.h.bf16 %v298_v20  ;;  %v526_v38 = vadd.f32 %v1820_v59, %v440_v28 }
  0x4e   : > { %v627_v36 = vpack.c.bf16 %v591_v25, %v587_v17  ;;  %v593_v37 = vmax.f32 %v529_v26, 0.0  ;;  %v442_v39 = vmul.f32 %v1824_v62, %v356_v29  ;;  %v524_v42 = vadd.f32 %v1826_v63, %v438_v33 }
  0x4f   : > { %970 = vmatmul.mubr.bf16.gmra.mrb[20].mxu0 %v622_v12  ;;  %v586_v41 = vmax.f32 %v522_v32, 0.0  ;;  %v363_v43 = vunpack.c.h.bf16 %v300_v30  ;;  %v445_v44 = vmul.f32 %v1808_v48, %v359_v34  ;;  %v590_v46 = vmax.f32 %v526_v38, 0.0 }
  0x50   : > { %1067 = vmatmul.mubr.bf16.gmra.mrb[20].mxu1 %v624_v21  ;;  %977 = vmatprep.mubr.bf16.mxu0 %v627_v36  ;;  %v629_v45 = vpack.c.bf16 %v593_v37, %v589_v31  ;;  %v528_v47 = vadd.f32 %v1826_v63, %v442_v39  ;;  %v361_v50 = vunpack.c.h.bf16 %v299_v35  ;;  %v588_v51 = vmax.f32 %v524_v42, 0.0 }
  0x51   : > { %v449_v52 = vmul.f32 %v1808_v48, %v363_v43  ;;  %v531_v53 = vadd.f32 %v1810_v49, %v445_v44  ;;  %v365_v56 = vunpack.c.h.bf16 %v301_v40  ;;  %v626_v57 = vpack.c.bf16 %v590_v46, %v586_v41 }
  0x52   : > { %1074 = vmatprep.mubr.bf16.mxu1 %v629_v45  ;;  %v592_v60 = vmax.f32 %v528_v47, 0.0  ;;  %v447_v61 = vmul.f32 %v1812_v54, %v361_v50  ;;  %v358_v0 = vunpack.c.l.bf16 %v298_v20  ;;  %v362_v4 = vunpack.c.l.bf16 %v300_v30 }
  0x53   : > { %v535_v1 = vadd.f32 %v1810_v49, %v449_v52  ;;  %v595_v2 = vmax.f32 %v531_v53, 0.0  ;;  %v451_v3 = vmul.f32 %v1812_v54, %v365_v56  ;;  %v360_v7 = vunpack.c.l.bf16 %v299_v35 }
  0x54   : > { %v628_v5 = vpack.c.bf16 %v592_v60, %v588_v51  ;;  %v533_v6 = vadd.f32 %v1814_v55, %v447_v61  ;;  %v444_v48 = vmul.f32 %v1818_v58, %v358_v0  ;;  %v448_v10 = vmul.f32 %v1818_v58, %v362_v4 }
  0x55   : > { %v599_v8 = vmax.f32 %v535_v1, 0.0  ;;  %v537_v9 = vadd.f32 %v1814_v55, %v451_v3  ;;  %v364_v11 = vunpack.c.l.bf16 %v301_v40  ;;  %v446_v54 = vmul.f32 %v1824_v62, %v360_v7 }
  0x56   : > { %v597_v12 = vmax.f32 %v533_v6, 0.0  ;;  %v530_v49 = vadd.f32 %v1820_v59, %v444_v48  ;;  %v534_v15 = vadd.f32 %v1820_v59, %v448_v10 }
  0x57   : > { %978 = vmatmul.mubr.bf16.gmra.mrb[24].mxu0 %v626_v57  ;;  %v631_v13 = vpack.c.bf16 %v599_v8, %v595_v2  ;;  %v601_v14 = vmax.f32 %v537_v9, 0.0  ;;  %v450_v16 = vmul.f32 %v1824_v62, %v364_v11  ;;  %v532_v18 = vadd.f32 %v1826_v63, %v446_v54  ;;  %v1983_v62 = vld [vmem:[%s2029_s4] ss:$0 sm:$0xff] }
  0x58   : > { %1075 = vmatmul.mubr.bf16.gmra.mrb[24].mxu1 %v628_v5  ;;  %v594_v17 = vmax.f32 %v530_v49, 0.0  ;;  %v598_v19 = vmax.f32 %v534_v15, 0.0 }
  0x59   : > { %985 = vmatprep.mubr.bf16.mxu0 %v631_v13  ;;  %v633_v55 = vpack.c.bf16 %v601_v14, %v597_v12  ;;  %v536_v58 = vadd.f32 %v1826_v63, %v450_v16  ;;  %v596_v20 = vmax.f32 %v532_v18, 0.0 }
  0x5a   : > { %v630_v21 = vpack.c.bf16 %v598_v19, %v594_v17 }
  0x5b   : > { %1082 = vmatprep.mubr.bf16.mxu1 %v633_v55  ;;  %v600_v22 = vmax.f32 %v536_v58, 0.0 }
  0x5d   : > { %v632_v23 = vpack.c.bf16 %v600_v22, %v596_v20 }
  0x5f   : > { %986 = vmatmul.mubr.bf16.gmra.mrb[28].mxu0 %v630_v21 }
  0x60   : > { %1083 = vmatmul.mubr.bf16.gmra.mrb[28].mxu1 %v632_v23 }
  0xfa   : > { %v1482_v24 = vpop.f32.mrb[0].mxu0 }
  0xfb   : > { %v1546_v59 = vpop.f32.mrb[0].mxu1  ;;  %v1483_v25 = vpop.f32.mrb[1].mxu0 }
  0xfc   : > { %v1484_v26 = vadd.f32 %v1483_v25, %v1482_v24  ;;  %v1547_v28 = vpop.f32.mrb[1].mxu1  ;;  %v1485_v29 = vpop.f32.mrb[2].mxu0 }
  0xfd   : > { %v1548_v63 = vadd.f32 %v1547_v28, %v1546_v59  ;;  %v1549_v30 = vpop.f32.mrb[2].mxu1  ;;  %v1486_v31 = vpop.f32.mrb[3].mxu0 }
  0xfe   : > { %v932_v32 = vadd.f32 %v1484_v26, %v1983_v62  ;;  %v1487_v33 = vadd.f32 %v1486_v31, %v1485_v29  ;;  %v1550_v34 = vpop.f32.mrb[3].mxu1 }
  0xff   : > { %v1551_v35 = vadd.f32 %v1550_v34, %v1549_v30 }
 0x100   : > { %v1029_v36 = vadd.f32 %v1548_v63, %v932_v32  ;;  %v935_v37 = vadd.f32 %v1487_v33, %v1983_v62 }
 0x102   : > { %v1032_v38 = vadd.f32 %v1551_v35, %v935_v37  ;;  %v1488_v39 = vpop.f32.mrb[4].mxu0 }
 0x103   : > { %v1489_v41 = vpop.f32.mrb[5].mxu0  ;;  %v1552_v42 = vpop.f32.mrb[4].mxu1 }
 0x104   : > { %v1091_v40 = vpack.c.bf16 %v1032_v38, %v1029_v36  ;;  %v1490_v43 = vadd.f32 %v1489_v41, %v1488_v39  ;;  %v1491_v44 = vpop.f32.mrb[6].mxu0  ;;  %v1553_v45 = vpop.f32.mrb[5].mxu1 }
 0x105   : > { %v1492_v46 = vpop.f32.mrb[7].mxu0  ;;  %v1554_v50 = vadd.f32 %v1553_v45, %v1552_v42  ;;  %v1555_v51 = vpop.f32.mrb[6].mxu1 }
 0x106   : > { %1423 = vst [vmem:[%s1991_s13] sm:$0xff] %v1091_v40   ;;  %v940_v47 = vadd.f32 %v1490_v43, %v1983_v62  ;;  %v1493_v52 = vadd.f32 %v1492_v46, %v1491_v44  ;;  %v1171_v53 = vunpack.c.l.bf16 %v1091_v40  ;;  %v1556_v56 = vpop.f32.mrb[7].mxu1  ;;  %v1172_v57 = vunpack.c.h.bf16 %v1091_v40 }
 0x107   : > { %v1557_v0 = vadd.f32 %v1556_v56, %v1555_v51 }
 0x108   : > { %v1037_v60 = vadd.f32 %v1554_v50, %v940_v47  ;;  %v943_v61 = vadd.f32 %v1493_v52, %v1983_v62  ;;  %v1208_v3 = vmul.f32 %v1171_v53, %v1171_v53  ;;  %v1209_v4 = vmul.f32 %v1172_v57, %v1172_v57 }
 0x109   : > { %v1187_v8 = vadd.f32 %v1172_v57, %v1171_v53 }
 0x10a   : > { %v1040_v1 = vadd.f32 %v1557_v0, %v943_v61  ;;  %v1494_v2 = vpop.f32.mrb[8].mxu0  ;;  %v1224_v14 = vadd.f32 %v1209_v4, %v1208_v3 }
 0x10b   : > { %v1495_v6 = vpop.f32.mrb[9].mxu0  ;;  %v1558_v11 = vpop.f32.mrb[8].mxu1 }
 0x10c   : > { %v1092_v5 = vpack.c.bf16 %v1040_v1, %v1037_v60  ;;  %v1496_v48 = vadd.f32 %v1495_v6, %v1494_v2  ;;  %v1497_v7 = vpop.f32.mrb[10].mxu0  ;;  %v1559_v54 = vpop.f32.mrb[9].mxu1 }
 0x10d   : > { %v1498_v12 = vpop.f32.mrb[11].mxu0  ;;  %v1560_v17 = vadd.f32 %v1559_v54, %v1558_v11  ;;  %v1561_v18 = vpop.f32.mrb[10].mxu1 }
 0x10e   : > { %1459 = vst [vmem:[%s1991_s13 + $0x8] sm:$0xff] %v1092_v5   ;;  %v1173_v9 = vunpack.c.l.bf16 %v1092_v5  ;;  %v1174_v10 = vunpack.c.h.bf16 %v1092_v5  ;;  %v948_v49 = vadd.f32 %v1496_v48, %v1983_v62  ;;  %v1499_v13 = vadd.f32 %v1498_v12, %v1497_v7  ;;  %v1562_v58 = vpop.f32.mrb[11].mxu1 }
 0x10f   : > { %v1563_v23 = vadd.f32 %v1562_v58, %v1561_v18 }
 0x110   : > { %v1188_v15 = vadd.f32 %v1187_v8, %v1173_v9  ;;  %v1210_v16 = vmul.f32 %v1173_v9, %v1173_v9  ;;  %v1211_v55 = vmul.f32 %v1174_v10, %v1174_v10  ;;  %v951_v19 = vadd.f32 %v1499_v13, %v1983_v62 }
 0x111   : > { %v1045_v22 = vadd.f32 %v1560_v17, %v948_v49 }
 0x112   : > { %v1189_v20 = vadd.f32 %v1188_v15, %v1174_v10  ;;  %v1225_v21 = vadd.f32 %v1224_v14, %v1210_v16  ;;  %v1048_v59 = vadd.f32 %v1563_v23, %v951_v19  ;;  %v1500_v25 = vpop.f32.mrb[12].mxu0 }
 0x113   : > { %v1501_v26 = vpop.f32.mrb[13].mxu0  ;;  %v1564_v30 = vpop.f32.mrb[12].mxu1 }
 0x114   : > { %v1226_v24 = vadd.f32 %v1225_v21, %v1211_v55  ;;  %v1093_v28 = vpack.c.bf16 %v1048_v59, %v1045_v22  ;;  %v1502_v29 = vadd.f32 %v1501_v26, %v1500_v25  ;;  %v1503_v63 = vpop.f32.mrb[14].mxu0  ;;  %v1565_v35 = vpop.f32.mrb[13].mxu1 }
 0x115   : > { %v1504_v31 = vpop.f32.mrb[15].mxu0  ;;  %v1566_v37 = vadd.f32 %v1565_v35, %v1564_v30  ;;  %v1567_v38 = vpop.f32.mrb[14].mxu1 }
 0x116   : > { %1460 = vst [vmem:[%s1991_s13 + $0x10] sm:$0xff] %v1093_v28   ;;  %v1175_v32 = vunpack.c.l.bf16 %v1093_v28  ;;  %v1176_v33 = vunpack.c.h.bf16 %v1093_v28  ;;  %v956_v34 = vadd.f32 %v1502_v29, %v1983_v62  ;;  %v1505_v36 = vadd.f32 %v1504_v31, %v1503_v63  ;;  %v1568_v42 = vpop.f32.mrb[15].mxu1 }
 0x117   : > { %v1569_v44 = vadd.f32 %v1568_v42, %v1567_v38 }
 0x118   : > { %v1190_v39 = vadd.f32 %v1189_v20, %v1175_v32  ;;  %v1212_v40 = vmul.f32 %v1175_v32, %v1175_v32  ;;  %v959_v41 = vadd.f32 %v1505_v36, %v1983_v62  ;;  %v1053_v43 = vadd.f32 %v1566_v37, %v956_v34 }
 0x119   : > { %v1213_v46 = vmul.f32 %v1176_v33, %v1176_v33 }
 0x11a   : > { %v1191_v45 = vadd.f32 %v1190_v39, %v1176_v33  ;;  %v1227_v47 = vadd.f32 %v1226_v24, %v1212_v40  ;;  %v1056_v50 = vadd.f32 %v1569_v44, %v959_v41  ;;  %v1506_v52 = vpop.f32.mrb[16].mxu0 }
 0x11b   : > { %v1507_v56 = vpop.f32.mrb[17].mxu0  ;;  %v1570_v57 = vpop.f32.mrb[16].mxu1 }
 0x11c   : > { %v1228_v51 = vadd.f32 %v1227_v47, %v1213_v46  ;;  %v1094_v53 = vpack.c.bf16 %v1056_v50, %v1053_v43  ;;  %v1508_v60 = vadd.f32 %v1507_v56, %v1506_v52  ;;  %v1509_v61 = vpop.f32.mrb[18].mxu0  ;;  %v1571_v2 = vpop.f32.mrb[17].mxu1 }
 0x11d   : > { %v1510_v3 = vpop.f32.mrb[19].mxu0  ;;  %v1572_v5 = vadd.f32 %v1571_v2, %v1570_v57  ;;  %v1573_v6 = vpop.f32.mrb[18].mxu1 }
 0x11e   : > { %1461 = vst [vmem:[%s1991_s13 + $0x18] sm:$0xff] %v1094_v53   ;;  %v1177_v0 = vunpack.c.l.bf16 %v1094_v53  ;;  %v1178_v1 = vunpack.c.h.bf16 %v1094_v53  ;;  %v964_v4 = vadd.f32 %v1508_v60, %v1983_v62  ;;  %v1511_v48 = vadd.f32 %v1510_v3, %v1509_v61  ;;  %v1574_v9 = vpop.f32.mrb[19].mxu1 }
 0x11f   : > { %v1575_v12 = vadd.f32 %v1574_v9, %v1573_v6 }
 0x120   : > { %v1192_v7 = vadd.f32 %v1191_v45, %v1177_v0  ;;  %v1214_v8 = vmul.f32 %v1177_v0, %v1177_v0  ;;  %v1061_v10 = vadd.f32 %v1572_v5, %v964_v4  ;;  %v967_v11 = vadd.f32 %v1511_v48, %v1983_v62 }
 0x121   : > { %v1215_v54 = vmul.f32 %v1178_v1, %v1178_v1 }
 0x122   : > { %v1193_v49 = vadd.f32 %v1192_v7, %v1178_v1  ;;  %v1229_v13 = vadd.f32 %v1228_v51, %v1214_v8  ;;  %v1064_v14 = vadd.f32 %v1575_v12, %v967_v11  ;;  %v1512_v16 = vpop.f32.mrb[20].mxu0 }
 0x123   : > { %v1513_v18 = vpop.f32.mrb[21].mxu0  ;;  %v1576_v55 = vpop.f32.mrb[20].mxu1 }
 0x124   : > { %v1230_v15 = vadd.f32 %v1229_v13, %v1215_v54  ;;  %v1095_v17 = vpack.c.bf16 %v1064_v14, %v1061_v10  ;;  %v1514_v19 = vadd.f32 %v1513_v18, %v1512_v16  ;;  %v1515_v58 = vpop.f32.mrb[22].mxu0  ;;  %v1577_v22 = vpop.f32.mrb[21].mxu1 }
 0x125   : > { %v1516_v23 = vpop.f32.mrb[23].mxu0  ;;  %v1578_v59 = vadd.f32 %v1577_v22, %v1576_v55  ;;  %v1579_v25 = vpop.f32.mrb[22].mxu1 }
 0x126   : > { %1462 = vst [vmem:[%s1991_s13 + $0x20] sm:$0xff] %v1095_v17   ;;  %v1179_v20 = vunpack.c.l.bf16 %v1095_v17  ;;  %v1180_v21 = vunpack.c.h.bf16 %v1095_v17  ;;  %v972_v24 = vadd.f32 %v1514_v19, %v1983_v62  ;;  %v1517_v26 = vadd.f32 %v1516_v23, %v1515_v58  ;;  %v1580_v63 = vpop.f32.mrb[23].mxu1 }
 0x127   : > { %v1581_v32 = vadd.f32 %v1580_v63, %v1579_v25 }
 0x128   : > { %v1194_v28 = vadd.f32 %v1193_v49, %v1179_v20  ;;  %v1216_v29 = vmul.f32 %v1179_v20, %v1179_v20  ;;  %v1069_v30 = vadd.f32 %v1578_v59, %v972_v24  ;;  %v975_v31 = vadd.f32 %v1517_v26, %v1983_v62 }
 0x129   : > { %v1217_v34 = vmul.f32 %v1180_v21, %v1180_v21 }
 0x12a   : > { %v1195_v33 = vadd.f32 %v1194_v28, %v1180_v21  ;;  %v1231_v35 = vadd.f32 %v1230_v15, %v1216_v29  ;;  %v1072_v36 = vadd.f32 %v1581_v32, %v975_v31  ;;  %v1518_v38 = vpop.f32.mrb[24].mxu0 }
 0x12b   : > { %v1519_v40 = vpop.f32.mrb[25].mxu0  ;;  %v1582_v41 = vpop.f32.mrb[24].mxu1 }
 0x12c   : > { %v1232_v37 = vadd.f32 %v1231_v35, %v1217_v34  ;;  %v1096_v39 = vpack.c.bf16 %v1072_v36, %v1069_v30  ;;  %v1520_v42 = vadd.f32 %v1519_v40, %v1518_v38  ;;  %v1521_v43 = vpop.f32.mrb[26].mxu0  ;;  %v1583_v46 = vpop.f32.mrb[25].mxu1 }
 0x12d   : > { %v1522_v47 = vpop.f32.mrb[27].mxu0  ;;  %v1584_v51 = vadd.f32 %v1583_v46, %v1582_v41  ;;  %v1585_v52 = vpop.f32.mrb[26].mxu1 }
 0x12e   : > { %1463 = vst [vmem:[%s1991_s13 + $0x28] sm:$0xff] %v1096_v39   ;;  %v1181_v44 = vunpack.c.l.bf16 %v1096_v39  ;;  %v1182_v45 = vunpack.c.h.bf16 %v1096_v39  ;;  %v980_v50 = vadd.f32 %v1520_v42, %v1983_v62  ;;  %v1523_v53 = vadd.f32 %v1522_v47, %v1521_v43  ;;  %v1586_v60 = vpop.f32.mrb[27].mxu1 }
 0x12f   : > { %v1587_v1 = vadd.f32 %v1586_v60, %v1585_v52 }
 0x130   : > { %v1196_v56 = vadd.f32 %v1195_v33, %v1181_v44  ;;  %v1218_v57 = vmul.f32 %v1181_v44, %v1181_v44  ;;  %v1077_v61 = vadd.f32 %v1584_v51, %v980_v50  ;;  %v983_v0 = vadd.f32 %v1523_v53, %v1983_v62 }
 0x131   : > { %v1219_v3 = vmul.f32 %v1182_v45, %v1182_v45 }
 0x132   : > { %v1197_v2 = vadd.f32 %v1196_v56, %v1182_v45  ;;  %v1233_v4 = vadd.f32 %v1232_v37, %v1218_v57  ;;  %v1080_v5 = vadd.f32 %v1587_v1, %v983_v0  ;;  %v1524_v48 = vpop.f32.mrb[28].mxu0 }
 0x133   : > { %v1525_v8 = vpop.f32.mrb[29].mxu0  ;;  %v1588_v9 = vpop.f32.mrb[28].mxu1 }
 0x134   : > { %v1234_v6 = vadd.f32 %v1233_v4, %v1219_v3  ;;  %v1097_v7 = vpack.c.bf16 %v1080_v5, %v1077_v61  ;;  %v1526_v10 = vadd.f32 %v1525_v8, %v1524_v48  ;;  %v1527_v11 = vpop.f32.mrb[30].mxu0  ;;  %v1589_v54 = vpop.f32.mrb[29].mxu1 }
 0x135   : > { %v1528_v13 = vpop.f32.mrb[31].mxu0  ;;  %v1590_v15 = vadd.f32 %v1589_v54, %v1588_v9  ;;  %v1591_v16 = vpop.f32.mrb[30].mxu1 }
 0x136   : > { %1464 = vst [vmem:[%s1991_s13 + $0x30] sm:$0xff] %v1097_v7   ;;  %v1183_v12 = vunpack.c.l.bf16 %v1097_v7  ;;  %v1184_v49 = vunpack.c.h.bf16 %v1097_v7  ;;  %v988_v14 = vadd.f32 %v1526_v10, %v1983_v62  ;;  %v1529_v17 = vadd.f32 %v1528_v13, %v1527_v11  ;;  %v1592_v19 = vpop.f32.mrb[31].mxu1 }
 0x137   : > { %v1593_v21 = vadd.f32 %v1592_v19, %v1591_v16 }
 0x138   : > { %v1198_v18 = vadd.f32 %v1197_v2, %v1183_v12  ;;  %v1220_v55 = vmul.f32 %v1183_v12, %v1183_v12  ;;  %v1085_v58 = vadd.f32 %v1590_v15, %v988_v14  ;;  %v991_v20 = vadd.f32 %v1529_v17, %v1983_v62 }
 0x139   : > { %v1221_v23 = vmul.f32 %v1184_v49, %v1184_v49 }
 0x13a   : > { %v1199_v22 = vadd.f32 %v1198_v18, %v1184_v49  ;;  %v1235_v24 = vadd.f32 %v1234_v6, %v1220_v55  ;;  %v1088_v59 = vadd.f32 %v1593_v21, %v991_v20 }
 0x13c   : > { %v1236_v25 = vadd.f32 %v1235_v24, %v1221_v23  ;;  %v1098_v26 = vpack.c.bf16 %v1088_v59, %v1085_v58 }
 0x13e   : > { %1465 = vst [vmem:[%s1991_s13 + $0x38] sm:$0xff] %v1098_v26   ;;  %v1185_v28 = vunpack.c.l.bf16 %v1098_v26  ;;  %v1186_v29 = vunpack.c.h.bf16 %v1098_v26 }
 0x140   : > { %v1200_v63 = vadd.f32 %v1199_v22, %v1185_v28  ;;  %v1222_v30 = vmul.f32 %v1185_v28, %v1185_v28  ;;  %v1223_v32 = vmul.f32 %v1186_v29, %v1186_v29 }
 0x142   : > { %v1201_v31 = vadd.f32 %v1200_v63, %v1186_v29  ;;  %v1237_v33 = vadd.f32 %v1236_v25, %v1222_v30 }
 0x144   : > { %v1202_v34 = vrot.slane %v1201_v31, 4  ;;  %v1238_v35 = vadd.f32 %v1237_v33, %v1223_v32 }
 0x146   : > { %v1203_v62 = vadd.f32 %v1202_v34, %v1201_v31  ;;  %v1239_v36 = vrot.slane %v1238_v35, 4 }
 0x148   : > { %v1204_v37 = vrot.slane %v1203_v62, 2  ;;  %v1240_v38 = vadd.f32 %v1239_v36, %v1238_v35 }
 0x14a   : > { %v1205_v39 = vadd.f32 %v1204_v37, %v1203_v62  ;;  %v1241_v40 = vrot.slane %v1240_v38, 2 }
 0x14c   : > { %v1206_v41 = vrot.slane %v1205_v39, 1  ;;  %v1242_v42 = vadd.f32 %v1241_v40, %v1240_v38 }
 0x14e   : > { %v1207_v43 = vadd.f32 %v1206_v41, %v1205_v39  ;;  %v1243_v44 = vrot.slane %v1242_v42, 1 }
 0x150   : > { %v1244_v45 = vadd.f32 %v1243_v44, %v1242_v42  ;;  %v1248_v46 = vsel %vm1247_vm0, %v1207_v43, 0.0 }
 0x152   : > { %v1250_v47 = vsel %vm1249_vm1, %v1244_v45, 0.0 }
 0x153   : > { %v1251_v50 = vadd.f32 %v1250_v47, %v1248_v46 }
 0x155   : > { %1252 = vst [vmem:[%s268_s16] sm:$0xff] %v1251_v50 }
 0x156 PF: > { %s17_s21 = sadd.s32 1, %s1640_s21  }
 0x157   : > { %p14_p5 = scmp.ge.s32.totalorder %s17_s21, 4  }
 0x159   :  { %16 = sbr.rel (!%p14_p5) target bundleno = 1 (0x1), region = 82 }

</bundles_post_ra>
